<compile_context>
chip_gen: v5e
topology: v5e:2x2
jax: 0.10.0
libtpu: 0.0.40
codegen_flags: <defaults>
</compile_context>

<pallas_src>
import functools
import math

import numpy as np
import jax
import jax.numpy as jnp
from jax import lax
from jax.experimental import pallas as pl
from jax.experimental.pallas import tpu as pltpu


_VMEM = functools.partial(pl.BlockSpec, memory_space=pltpu.MemorySpace.VMEM)


# ---------------------------------------------------------------------------
# Single fused kernel: conv stack + mask + GRU + STL attention + bottleneck.
# ---------------------------------------------------------------------------
def _fused_prosody_kernel(*refs, n_layers, n_batch, t_steps, gru_h,
                          inv_sqrt_key_dim):
    a0_ref, mask_ref = refs[0], refs[1]
    conv_refs = [refs[2 + 4 * l: 2 + 4 * (l + 1)] for l in range(n_layers)]
    (wih_ref, whh_ref, bih_ref, bhh_ref,
     wprj_ref, bprj_ref, wq_ref, kt_ref, v_ref, wbn_ref, bbn_ref,
     o_ref, gi_ref) = refs[2 + 4 * n_layers:]

    def conv_bn_relu(a, s_ref, m_ref, sc_ref, sh_ref):
        # a: [rows_in, W_in*C_in] bf16 -> [rows_out, W_out*C_out] bf16
        acc = None
        for i in range(3):                      # 3 time (kh) taps, MXU-accumulated
            rows = jnp.dot(s_ref[i], a, preferred_element_type=jnp.float32)
            part = jnp.dot(rows.astype(jnp.bfloat16), m_ref[i],
                           preferred_element_type=jnp.float32)
            acc = part if acc is None else acc + part
        y = jnp.maximum(acc * sc_ref[...] + sh_ref[...], 0.0)   # folded BN + ReLU
        return y.astype(jnp.bfloat16)

    a = a0_ref[...]                             # [N*T0, W0*C0] bf16
    for s_ref, m_ref, sc_ref, sh_ref in conv_refs:
        a = conv_bn_relu(a, s_ref, m_ref, sc_ref, sh_ref)
    # a: [T'*N, W'*C'] bf16, rows in time-major (t, n) order.

    # masked_fill(mask, 0) folded in-kernel (mask_ref: 1.0 = keep, 0.0 = masked).
    a = (a.astype(jnp.float32) * mask_ref[...]).astype(jnp.bfloat16)

    # GRU: input-to-hidden matmul hoisted out of the recurrence (one MXU call).
    gi_ref[...] = jnp.dot(a, wih_ref[...],
                          preferred_element_type=jnp.float32) + bih_ref[...]

    def gru_step(t, h):
        r0 = pl.multiple_of(t * n_batch, n_batch)
        gi = gi_ref[pl.ds(r0, n_batch), :]                      # [N, 3H] f32
        gh = jnp.dot(h.astype(jnp.bfloat16), whh_ref[...],
                     preferred_element_type=jnp.float32) + bhh_ref[...]
        r = jax.nn.sigmoid(gi[:, :gru_h] + gh[:, :gru_h])
        z = jax.nn.sigmoid(gi[:, gru_h:2 * gru_h] + gh[:, gru_h:2 * gru_h])
        c = jnp.tanh(gi[:, 2 * gru_h:] + r * gh[:, 2 * gru_h:])
        return (1.0 - z) * c + z * h

    h0 = jnp.zeros((n_batch, gru_h), jnp.float32)
    h = lax.fori_loop(0, t_steps, gru_step, h0, unroll=min(t_steps, 8))

    # encoder_prj -> STL single-head attention (precomputed K^T, V) -> bottleneck.
    q_in = jnp.dot(h.astype(jnp.bfloat16), wprj_ref[...],
                   preferred_element_type=jnp.float32) + bprj_ref[...]
    q = jnp.dot(q_in.astype(jnp.bfloat16), wq_ref[...],
                preferred_element_type=jnp.float32)
    scores = jnp.dot(q.astype(jnp.bfloat16), kt_ref[...],
                     preferred_element_type=jnp.float32) * inv_sqrt_key_dim
    m = jnp.max(scores, axis=-1, keepdims=True)
    e = jnp.exp(scores - m)
    p = e * pl.reciprocal(jnp.sum(e, axis=-1, keepdims=True), approx=True)
    attn = jnp.dot(p.astype(jnp.bfloat16), v_ref[...],
                   preferred_element_type=jnp.float32)
    o_ref[...] = jnp.dot(attn.astype(jnp.bfloat16), wbn_ref[...],
                         preferred_element_type=jnp.float32) + bbn_ref[...]


# ---------------------------------------------------------------------------
# Static structural helpers (built once at parameter-packing time).
# ---------------------------------------------------------------------------
def _conv_out(l, stride, pad, k=3):
    return (l - k + 2 * pad) // stride + 1


def _layer_dims(t_mel, n_mels, filters, stride, pad):
    """(H, W, C) per layer, starting after AddCoords (C = 1 + 2 + 1 = 4)."""
    dims = [(t_mel, n_mels, 4)]
    for cout in filters:
        h, w, _ = dims[-1]
        dims.append((_conv_out(h, stride, pad), _conv_out(w, stride, pad), cout))
    return dims


def _build_row_select(n_batch, h_in, h_out, stride, pad, time_major):
    """S[i]: [N*H_out, N*H_in] 0/1 row selection for time tap i (zero-pad aware)."""
    s = np.zeros((3, n_batch * h_out, n_batch * h_in), np.float32)
    for i in range(3):
        for n in range(n_batch):
            for ho in range(h_out):
                h = ho * stride + i - pad
                if 0 <= h < h_in:
                    row = ho * n_batch + n if time_major else n * h_out + ho
                    s[i, row, n * h_in + h] = 1.0
    return s


def _build_band_matrix(w_conv, w_in, w_out, stride, pad):
    """M[i]: [W_in*C_in, W_out*C_out] folding width taps + channel mixing."""
    cout, cin, kh, kw = w_conv.shape
    sel = np.zeros((kw, w_in, w_out), np.float32)
    for wo in range(w_out):
        for j in range(kw):
            w = wo * stride + j - pad
            if 0 <= w < w_in:
                sel[j, w, wo] = 1.0
    # out[i, w, ci, wo, co] = sum_j sel[j, w, wo] * W[co, ci, i, j]
    m = jnp.einsum("jwv,ocij->iwcvo", jnp.asarray(sel), w_conv)
    return m.reshape(kh, w_in * cin, w_out * cout)


def pack_params(params, cfg, n_batch, t_mel):
    """One-time repacking of module parameters into the fused kernel's layout."""
    stride, pad = cfg["stride"], cfg["pad"]
    dims = _layer_dims(t_mel, cfg["n_mels"], cfg["filters"], stride, pad)
    n_layers = len(cfg["filters"])

    packed = {"dims": dims}
    s_list, m_list, sc_list, sh_list = [], [], [], []
    for l in range(n_layers):
        h_in, w_in, _ = dims[l]
        h_out, w_out, c_out = dims[l + 1]
        time_major = (l == n_layers - 1)   # last layer emits time-major rows (t, n)
        s_list.append(jnp.asarray(
            _build_row_select(n_batch, h_in, h_out, stride, pad, time_major),
            jnp.bfloat16))
        m_list.append(_build_band_matrix(params["conv_w"][l], w_in, w_out,
                                         stride, pad).astype(jnp.bfloat16))
        sc_list.append(jnp.tile(params["bn_scale"][l], w_out)
                       .reshape(1, w_out * c_out))
        sh_list.append(jnp.tile(params["bn_shift"][l], w_out)
                       .reshape(1, w_out * c_out))
    packed["S"], packed["M"] = s_list, m_list
    packed["scale"], packed["shift"] = sc_list, sh_list

    # GRU input lanes are packed (w, c) by the conv slab; torch packs (c, w):
    # permute W_ih rows once so the kernel matmul matches the reference.
    _, w_last, c_last = dims[-1]
    perm = np.array([c * w_last + w for w in range(w_last) for c in range(c_last)],
                    np.int32)
    packed["wih"] = params["gru_wih"][perm, :].astype(jnp.bfloat16)
    packed["whh"] = params["gru_whh"].astype(jnp.bfloat16)
    packed["bih"] = params["gru_bih"]
    packed["bhh"] = params["gru_bhh"]

    # STL keys/values are input-independent constants -> precompute (K transposed).
    keys = jnp.tanh(params["embed"])
    packed["wprj"] = params["wprj"].astype(jnp.bfloat16)
    packed["bprj"] = params["bprj"]
    packed["wq"] = params["wq"].astype(jnp.bfloat16)
    packed["kt"] = jnp.dot(keys, params["wk"]).T.astype(jnp.bfloat16)   # [E, tok]
    packed["v"] = jnp.dot(keys, params["wv"]).astype(jnp.bfloat16)      # [tok, E]
    packed["wbn"] = params["wbn"].astype(jnp.bfloat16)
    packed["bbn"] = params["bbn"]
    return packed


# ---------------------------------------------------------------------------
# Full forward pass of UtteranceLevelProsodyEncoder (one pallas_call).
# ---------------------------------------------------------------------------
def utterance_level_prosody_encoder(mels, mel_mask, packed, cfg):
    n_batch, t_mel, n_mels = mels.shape
    dims = packed["dims"]
    n_layers = len(cfg["filters"])
    t_out = dims[-1][0]
    gru_h = cfg["gru_size"]
    bott = cfg["bottleneck"]

    # Input prep (single XLA pass): CoordConv2d AddCoords (with_r=True) + pack
    # (w, c) onto the lane axis -> A0 [N*T, n_mels*4], rows batch-major (n, t).
    # TODO(synk): AddCoords convention assumed to be the Uber CoordConv variant
    # (xx along time, yy along mel, both in [-1,1]; rr = sqrt((xx-.5)^2+(yy-.5)^2)).
    hs = jnp.arange(t_mel, dtype=jnp.float32) / (t_mel - 1) * 2.0 - 1.0
    ws = jnp.arange(n_mels, dtype=jnp.float32) / (n_mels - 1) * 2.0 - 1.0
    xx = jnp.broadcast_to(hs[:, None], (t_mel, n_mels))
    yy = jnp.broadcast_to(ws[None, :], (t_mel, n_mels))
    rr = jnp.sqrt((xx - 0.5) ** 2 + (yy - 0.5) ** 2)
    coords = jnp.broadcast_to(jnp.stack([xx, yy, rr], axis=-1)[None],
                              (n_batch, t_mel, n_mels, 3))
    a0 = jnp.concatenate([mels.astype(jnp.float32)[..., None], coords], axis=-1)
    a0 = a0.reshape(n_batch * t_mel, n_mels * 4).astype(jnp.bfloat16)

    # masked_fill mask at the conv-downsampled T' resolution; rows time-major (t, n).
    if mel_mask is not None:
        keep = (~mel_mask).astype(jnp.float32)              # [N, T']
    else:
        keep = jnp.ones((n_batch, t_out), jnp.float32)
    mask_col = keep.T.reshape(t_out * n_batch, 1)

    conv_args = []
    for l in range(n_layers):
        conv_args += [packed["S"][l], packed["M"][l],
                      packed["scale"][l], packed["shift"][l]]

    kern = functools.partial(
        _fused_prosody_kernel,
        n_layers=n_layers, n_batch=n_batch, t_steps=t_out, gru_h=gru_h,
        inv_sqrt_key_dim=1.0 / math.sqrt(float(cfg["E"])))

    # TODO(synk): for production mel lengths (T~1000, n_mels=80) add a grid over
    # the conv-slab row dimension with generation-specific tiles (v7x: smaller
    # tiles + parallel dimension_semantics; v6e/v5e: ~2x larger); at these
    # shapes everything fits VMEM so the call stays gridless.
    out = pl.pallas_call(
        kern,
        out_shape=jax.ShapeDtypeStruct((n_batch, bott), jnp.float32),
        in_specs=[_VMEM()] * (4 * n_layers + 13),
        out_specs=_VMEM(),
        scratch_shapes=[pltpu.VMEM((t_out * n_batch, 3 * gru_h), jnp.float32)],
    )(a0, mask_col, *conv_args,
      packed["wih"], packed["whh"], packed["bih"], packed["bhh"],
      packed["wprj"], packed["bprj"], packed["wq"], packed["kt"], packed["v"],
      packed["wbn"], packed["bbn"])

    return out[:, None, :]                       # [N, 1, bottleneck_size_u]


# ---------------------------------------------------------------------------
# Deterministic synthetic parameters (shapes follow the module's __init__).
# Linear / GRU weights are stored already transposed to [in, out] / [in, 3H];
# GRU gate order is the PyTorch (r, z, n) packing.
# ---------------------------------------------------------------------------
def init_params(key, cfg):
    keys = iter(jax.random.split(key, 32))

    def nrm(shape, std=0.1):
        return std * jax.random.normal(next(keys), shape, jnp.float32)

    eps = 1e-5
    # conv in-channels: CoordConv sees 1 + 2 + 1(with_r) = 4, then ref_enc_filters
    cins = [4] + cfg["filters"][:-1]
    conv_w, bn_scale, bn_shift = [], [], []
    for cin, cout in zip(cins, cfg["filters"]):
        w = nrm((cout, cin, 3, 3))          # torch Conv2d weight layout
        b = nrm((cout,))
        gamma = 1.0 + nrm((cout,))
        beta = nrm((cout,))
        r_mean = nrm((cout,))
        r_var = 1.0 + jnp.abs(nrm((cout,)))
        scale = gamma / jnp.sqrt(r_var + eps)          # inference-mode BN
        shift = scale * (b - r_mean) + beta            # conv bias folded in
        conv_w.append(w)
        bn_scale.append(scale)
        bn_shift.append(shift)

    l = cfg["n_mels"]
    for _ in cfg["filters"]:
        l = (l - 3 + 2 * cfg["pad"]) // cfg["stride"] + 1
    gru_in = cfg["filters"][-1] * l
    h = cfg["gru_size"]
    e = cfg["E"]

    params = dict(
        conv_w=conv_w, bn_scale=bn_scale, bn_shift=bn_shift,
        gru_wih=nrm((gru_in, 3 * h)), gru_whh=nrm((h, 3 * h)),
        gru_bih=nrm((1, 3 * h)), gru_bhh=nrm((1, 3 * h)),
        wprj=nrm((h, e // 2)), bprj=nrm((1, e // 2)),
        embed=0.5 * jax.random.normal(next(keys), (cfg["token_num"], e), jnp.float32),
        wq=nrm((e // 2, e)), wk=nrm((e, e)), wv=nrm((e, e)),
        wbn=nrm((e, cfg["bottleneck"])), bbn=nrm((1, cfg["bottleneck"])),
    )
    return params


if __name__ == "__main__":
    cfg = dict(
        E=32,                 # transformer.encoder_hidden
        n_mels=16,            # preprocessing.mel.n_mel_channels
        filters=[8, 8, 16],   # ref_enc_filters (K=3)
        stride=2, pad=1,      # ref_enc_strides / ref_enc_pad (ref_enc_size=3)
        gru_size=16,          # ref_enc_gru_size (= E//2)
        token_num=8,          # prosody token count
        bottleneck=16,        # bottleneck_size_u
    )
    n_batch, t_mel = 2, 16

    key = jax.random.PRNGKey(0)
    k_param, k_mel = jax.random.split(key)
    params = init_params(k_param, cfg)
    packed = pack_params(params, cfg, n_batch, t_mel)

    mels = jax.random.normal(k_mel, (n_batch, t_mel, cfg["n_mels"]), jnp.float32)

    # The reference masked_fill happens on the conv-downsampled time axis, so the
    # mask must already be at that resolution (T' after K stride-2 convs).
    t_down = t_mel
    for _ in cfg["filters"]:
        t_down = (t_down - 3 + 2 * cfg["pad"]) // cfg["stride"] + 1
    mel_mask = jnp.zeros((n_batch, t_down), dtype=bool).at[1, t_down - 1].set(True)

    out = utterance_level_prosody_encoder(mels, mel_mask, packed, cfg)
    out = jax.block_until_ready(out)
    assert out.shape == (n_batch, 1, cfg["bottleneck"]), out.shape
    print("KERNEL_OK")
</pallas_src>

<mosaic_0001>
module attributes {stable_mosaic.version = 11 : i64} {
  func.func @_fused_prosody_kernel(%arg0: memref<32x64xbf16, #tpu.memory_space<vmem>>, %arg1: memref<4x1xf32, #tpu.memory_space<vmem>>, %arg2: memref<3x16x32xbf16, #tpu.memory_space<vmem>>, %arg3: memref<3x64x64xbf16, #tpu.memory_space<vmem>>, %arg4: memref<1x64xf32, #tpu.memory_space<vmem>>, %arg5: memref<1x64xf32, #tpu.memory_space<vmem>>, %arg6: memref<3x8x16xbf16, #tpu.memory_space<vmem>>, %arg7: memref<3x64x32xbf16, #tpu.memory_space<vmem>>, %arg8: memref<1x32xf32, #tpu.memory_space<vmem>>, %arg9: memref<1x32xf32, #tpu.memory_space<vmem>>, %arg10: memref<3x4x8xbf16, #tpu.memory_space<vmem>>, %arg11: memref<3x32x32xbf16, #tpu.memory_space<vmem>>, %arg12: memref<1x32xf32, #tpu.memory_space<vmem>>, %arg13: memref<1x32xf32, #tpu.memory_space<vmem>>, %arg14: memref<32x48xbf16, #tpu.memory_space<vmem>>, %arg15: memref<16x48xbf16, #tpu.memory_space<vmem>>, %arg16: memref<1x48xf32, #tpu.memory_space<vmem>>, %arg17: memref<1x48xf32, #tpu.memory_space<vmem>>, %arg18: memref<16x16xbf16, #tpu.memory_space<vmem>>, %arg19: memref<1x16xf32, #tpu.memory_space<vmem>>, %arg20: memref<16x32xbf16, #tpu.memory_space<vmem>>, %arg21: memref<32x8xbf16, #tpu.memory_space<vmem>>, %arg22: memref<8x32xbf16, #tpu.memory_space<vmem>>, %arg23: memref<32x16xbf16, #tpu.memory_space<vmem>>, %arg24: memref<1x16xf32, #tpu.memory_space<vmem>>, %arg25: memref<2x16xf32, #tpu.memory_space<vmem>>, %arg26: memref<4x48xf32, #tpu.memory_space<vmem>>) attributes {dimension_semantics = [], scalar_prefetch = 0 : i64, scratch_operands = 1 : i64, tpu.core_type = #tpu.core_type<tc>} {
    %c0 = arith.constant 0 : index
    %c0_0 = arith.constant 0 : index
    %0 = vector.load %arg0[%c0, %c0_0] : memref<32x64xbf16, #tpu.memory_space<vmem>>, vector<32x64xbf16>
    %c0_1 = arith.constant 0 : index
    %c0_2 = arith.constant 0 : index
    %c0_3 = arith.constant 0 : index
    %1 = vector.load %arg2[%c0_1, %c0_2, %c0_3] : memref<3x16x32xbf16, #tpu.memory_space<vmem>>, vector<1x16x32xbf16>
    %2 = vector.shape_cast %1 : vector<1x16x32xbf16> to vector<16x32xbf16>
    %cst = arith.constant dense<0.000000e+00> : vector<16x64xf32>
    %3 = tpu.matmul %2, %0, %cst {dimension_numbers = #tpu.dot_dimension_numbers<[1], [0], [0], [1], [0, 0, 1, 1], [], []>} : vector<16x32xbf16>, vector<32x64xbf16>, vector<16x64xf32> -> vector<16x64xf32>
    %4 = arith.truncf %3 : vector<16x64xf32> to vector<16x64xbf16>
    %c0_4 = arith.constant 0 : index
    %c0_5 = arith.constant 0 : index
    %c0_6 = arith.constant 0 : index
    %5 = vector.load %arg3[%c0_4, %c0_5, %c0_6] : memref<3x64x64xbf16, #tpu.memory_space<vmem>>, vector<1x64x64xbf16>
    %6 = vector.shape_cast %5 : vector<1x64x64xbf16> to vector<64x64xbf16>
    %cst_7 = arith.constant dense<0.000000e+00> : vector<16x64xf32>
    %7 = tpu.matmul %4, %6, %cst_7 {dimension_numbers = #tpu.dot_dimension_numbers<[1], [0], [0], [1], [0, 0, 1, 1], [], []>} : vector<16x64xbf16>, vector<64x64xbf16>, vector<16x64xf32> -> vector<16x64xf32>
    %c1 = arith.constant 1 : index
    %c0_8 = arith.constant 0 : index
    %c0_9 = arith.constant 0 : index
    %8 = vector.load %arg2[%c1, %c0_8, %c0_9] : memref<3x16x32xbf16, #tpu.memory_space<vmem>>, vector<1x16x32xbf16>
    %9 = vector.shape_cast %8 : vector<1x16x32xbf16> to vector<16x32xbf16>
    %cst_10 = arith.constant dense<0.000000e+00> : vector<16x64xf32>
    %10 = tpu.matmul %9, %0, %cst_10 {dimension_numbers = #tpu.dot_dimension_numbers<[1], [0], [0], [1], [0, 0, 1, 1], [], []>} : vector<16x32xbf16>, vector<32x64xbf16>, vector<16x64xf32> -> vector<16x64xf32>
    %11 = arith.truncf %10 : vector<16x64xf32> to vector<16x64xbf16>
    %c1_11 = arith.constant 1 : index
    %c0_12 = arith.constant 0 : index
    %c0_13 = arith.constant 0 : index
    %12 = vector.load %arg3[%c1_11, %c0_12, %c0_13] : memref<3x64x64xbf16, #tpu.memory_space<vmem>>, vector<1x64x64xbf16>
    %13 = vector.shape_cast %12 : vector<1x64x64xbf16> to vector<64x64xbf16>
    %cst_14 = arith.constant dense<0.000000e+00> : vector<16x64xf32>
    %14 = tpu.matmul %11, %13, %cst_14 {dimension_numbers = #tpu.dot_dimension_numbers<[1], [0], [0], [1], [0, 0, 1, 1], [], []>} : vector<16x64xbf16>, vector<64x64xbf16>, vector<16x64xf32> -> vector<16x64xf32>
    %15 = arith.addf %7, %14 : vector<16x64xf32>
    %c2 = arith.constant 2 : index
    %c0_15 = arith.constant 0 : index
    %c0_16 = arith.constant 0 : index
    %16 = vector.load %arg2[%c2, %c0_15, %c0_16] : memref<3x16x32xbf16, #tpu.memory_space<vmem>>, vector<1x16x32xbf16>
    %17 = vector.shape_cast %16 : vector<1x16x32xbf16> to vector<16x32xbf16>
    %cst_17 = arith.constant dense<0.000000e+00> : vector<16x64xf32>
    %18 = tpu.matmul %17, %0, %cst_17 {dimension_numbers = #tpu.dot_dimension_numbers<[1], [0], [0], [1], [0, 0, 1, 1], [], []>} : vector<16x32xbf16>, vector<32x64xbf16>, vector<16x64xf32> -> vector<16x64xf32>
    %19 = arith.truncf %18 : vector<16x64xf32> to vector<16x64xbf16>
    %c2_18 = arith.constant 2 : index
    %c0_19 = arith.constant 0 : index
    %c0_20 = arith.constant 0 : index
    %20 = vector.load %arg3[%c2_18, %c0_19, %c0_20] : memref<3x64x64xbf16, #tpu.memory_space<vmem>>, vector<1x64x64xbf16>
    %21 = vector.shape_cast %20 : vector<1x64x64xbf16> to vector<64x64xbf16>
    %cst_21 = arith.constant dense<0.000000e+00> : vector<16x64xf32>
    %22 = tpu.matmul %19, %21, %cst_21 {dimension_numbers = #tpu.dot_dimension_numbers<[1], [0], [0], [1], [0, 0, 1, 1], [], []>} : vector<16x64xbf16>, vector<64x64xbf16>, vector<16x64xf32> -> vector<16x64xf32>
    %23 = arith.addf %15, %22 : vector<16x64xf32>
    %c0_22 = arith.constant 0 : index
    %c0_23 = arith.constant 0 : index
    %24 = vector.load %arg4[%c0_22, %c0_23] : memref<1x64xf32, #tpu.memory_space<vmem>>, vector<1x64xf32>
    %25 = vector.broadcast %24 : vector<1x64xf32> to vector<16x64xf32>
    %26 = arith.mulf %23, %25 : vector<16x64xf32>
    %c0_24 = arith.constant 0 : index
    %c0_25 = arith.constant 0 : index
    %27 = vector.load %arg5[%c0_24, %c0_25] : memref<1x64xf32, #tpu.memory_space<vmem>>, vector<1x64xf32>
    %28 = vector.broadcast %27 : vector<1x64xf32> to vector<16x64xf32>
    %29 = arith.addf %26, %28 : vector<16x64xf32>
    %cst_26 = arith.constant 0.000000e+00 : f32
    %30 = vector.broadcast %cst_26 : f32 to vector<16x64xf32>
    %31 = arith.maximumf %29, %30 : vector<16x64xf32>
    %32 = arith.truncf %31 : vector<16x64xf32> to vector<16x64xbf16>
    %c0_27 = arith.constant 0 : index
    %c0_28 = arith.constant 0 : index
    %c0_29 = arith.constant 0 : index
    %33 = vector.load %arg6[%c0_27, %c0_28, %c0_29] : memref<3x8x16xbf16, #tpu.memory_space<vmem>>, vector<1x8x16xbf16>
    %34 = vector.shape_cast %33 : vector<1x8x16xbf16> to vector<8x16xbf16>
    %cst_30 = arith.constant dense<0.000000e+00> : vector<8x64xf32>
    %35 = tpu.matmul %34, %32, %cst_30 {dimension_numbers = #tpu.dot_dimension_numbers<[1], [0], [0], [1], [0, 0, 1, 1], [], []>} : vector<8x16xbf16>, vector<16x64xbf16>, vector<8x64xf32> -> vector<8x64xf32>
    %36 = arith.truncf %35 : vector<8x64xf32> to vector<8x64xbf16>
    %c0_31 = arith.constant 0 : index
    %c0_32 = arith.constant 0 : index
    %c0_33 = arith.constant 0 : index
    %37 = vector.load %arg7[%c0_31, %c0_32, %c0_33] : memref<3x64x32xbf16, #tpu.memory_space<vmem>>, vector<1x64x32xbf16>
    %38 = vector.shape_cast %37 : vector<1x64x32xbf16> to vector<64x32xbf16>
    %cst_34 = arith.constant dense<0.000000e+00> : vector<8x32xf32>
    %39 = tpu.matmul %36, %38, %cst_34 {dimension_numbers = #tpu.dot_dimension_numbers<[1], [0], [0], [1], [0, 0, 1, 1], [], []>} : vector<8x64xbf16>, vector<64x32xbf16>, vector<8x32xf32> -> vector<8x32xf32>
    %c1_35 = arith.constant 1 : index
    %c0_36 = arith.constant 0 : index
    %c0_37 = arith.constant 0 : index
    %40 = vector.load %arg6[%c1_35, %c0_36, %c0_37] : memref<3x8x16xbf16, #tpu.memory_space<vmem>>, vector<1x8x16xbf16>
    %41 = vector.shape_cast %40 : vector<1x8x16xbf16> to vector<8x16xbf16>
    %cst_38 = arith.constant dense<0.000000e+00> : vector<8x64xf32>
    %42 = tpu.matmul %41, %32, %cst_38 {dimension_numbers = #tpu.dot_dimension_numbers<[1], [0], [0], [1], [0, 0, 1, 1], [], []>} : vector<8x16xbf16>, vector<16x64xbf16>, vector<8x64xf32> -> vector<8x64xf32>
    %43 = arith.truncf %42 : vector<8x64xf32> to vector<8x64xbf16>
    %c1_39 = arith.constant 1 : index
    %c0_40 = arith.constant 0 : index
    %c0_41 = arith.constant 0 : index
    %44 = vector.load %arg7[%c1_39, %c0_40, %c0_41] : memref<3x64x32xbf16, #tpu.memory_space<vmem>>, vector<1x64x32xbf16>
    %45 = vector.shape_cast %44 : vector<1x64x32xbf16> to vector<64x32xbf16>
    %cst_42 = arith.constant dense<0.000000e+00> : vector<8x32xf32>
    %46 = tpu.matmul %43, %45, %cst_42 {dimension_numbers = #tpu.dot_dimension_numbers<[1], [0], [0], [1], [0, 0, 1, 1], [], []>} : vector<8x64xbf16>, vector<64x32xbf16>, vector<8x32xf32> -> vector<8x32xf32>
    %47 = arith.addf %39, %46 : vector<8x32xf32>
    %c2_43 = arith.constant 2 : index
    %c0_44 = arith.constant 0 : index
    %c0_45 = arith.constant 0 : index
    %48 = vector.load %arg6[%c2_43, %c0_44, %c0_45] : memref<3x8x16xbf16, #tpu.memory_space<vmem>>, vector<1x8x16xbf16>
    %49 = vector.shape_cast %48 : vector<1x8x16xbf16> to vector<8x16xbf16>
    %cst_46 = arith.constant dense<0.000000e+00> : vector<8x64xf32>
    %50 = tpu.matmul %49, %32, %cst_46 {dimension_numbers = #tpu.dot_dimension_numbers<[1], [0], [0], [1], [0, 0, 1, 1], [], []>} : vector<8x16xbf16>, vector<16x64xbf16>, vector<8x64xf32> -> vector<8x64xf32>
    %51 = arith.truncf %50 : vector<8x64xf32> to vector<8x64xbf16>
    %c2_47 = arith.constant 2 : index
    %c0_48 = arith.constant 0 : index
    %c0_49 = arith.constant 0 : index
    %52 = vector.load %arg7[%c2_47, %c0_48, %c0_49] : memref<3x64x32xbf16, #tpu.memory_space<vmem>>, vector<1x64x32xbf16>
    %53 = vector.shape_cast %52 : vector<1x64x32xbf16> to vector<64x32xbf16>
    %cst_50 = arith.constant dense<0.000000e+00> : vector<8x32xf32>
    %54 = tpu.matmul %51, %53, %cst_50 {dimension_numbers = #tpu.dot_dimension_numbers<[1], [0], [0], [1], [0, 0, 1, 1], [], []>} : vector<8x64xbf16>, vector<64x32xbf16>, vector<8x32xf32> -> vector<8x32xf32>
    %55 = arith.addf %47, %54 : vector<8x32xf32>
    %c0_51 = arith.constant 0 : index
    %c0_52 = arith.constant 0 : index
    %56 = vector.load %arg8[%c0_51, %c0_52] : memref<1x32xf32, #tpu.memory_space<vmem>>, vector<1x32xf32>
    %57 = vector.broadcast %56 : vector<1x32xf32> to vector<8x32xf32>
    %58 = arith.mulf %55, %57 : vector<8x32xf32>
    %c0_53 = arith.constant 0 : index
    %c0_54 = arith.constant 0 : index
    %59 = vector.load %arg9[%c0_53, %c0_54] : memref<1x32xf32, #tpu.memory_space<vmem>>, vector<1x32xf32>
    %60 = vector.broadcast %59 : vector<1x32xf32> to vector<8x32xf32>
    %61 = arith.addf %58, %60 : vector<8x32xf32>
    %cst_55 = arith.constant 0.000000e+00 : f32
    %62 = vector.broadcast %cst_55 : f32 to vector<8x32xf32>
    %63 = arith.maximumf %61, %62 : vector<8x32xf32>
    %64 = arith.truncf %63 : vector<8x32xf32> to vector<8x32xbf16>
    %c0_56 = arith.constant 0 : index
    %c0_57 = arith.constant 0 : index
    %c0_58 = arith.constant 0 : index
    %65 = vector.load %arg10[%c0_56, %c0_57, %c0_58] : memref<3x4x8xbf16, #tpu.memory_space<vmem>>, vector<1x4x8xbf16>
    %66 = vector.shape_cast %65 : vector<1x4x8xbf16> to vector<4x8xbf16>
    %cst_59 = arith.constant dense<0.000000e+00> : vector<4x32xf32>
    %67 = tpu.matmul %66, %64, %cst_59 {dimension_numbers = #tpu.dot_dimension_numbers<[1], [0], [0], [1], [0, 0, 1, 1], [], []>} : vector<4x8xbf16>, vector<8x32xbf16>, vector<4x32xf32> -> vector<4x32xf32>
    %68 = arith.truncf %67 : vector<4x32xf32> to vector<4x32xbf16>
    %c0_60 = arith.constant 0 : index
    %c0_61 = arith.constant 0 : index
    %c0_62 = arith.constant 0 : index
    %69 = vector.load %arg11[%c0_60, %c0_61, %c0_62] : memref<3x32x32xbf16, #tpu.memory_space<vmem>>, vector<1x32x32xbf16>
    %70 = vector.shape_cast %69 : vector<1x32x32xbf16> to vector<32x32xbf16>
    %cst_63 = arith.constant dense<0.000000e+00> : vector<4x32xf32>
    %71 = tpu.matmul %68, %70, %cst_63 {dimension_numbers = #tpu.dot_dimension_numbers<[1], [0], [0], [1], [0, 0, 1, 1], [], []>} : vector<4x32xbf16>, vector<32x32xbf16>, vector<4x32xf32> -> vector<4x32xf32>
    %c1_64 = arith.constant 1 : index
    %c0_65 = arith.constant 0 : index
    %c0_66 = arith.constant 0 : index
    %72 = vector.load %arg10[%c1_64, %c0_65, %c0_66] : memref<3x4x8xbf16, #tpu.memory_space<vmem>>, vector<1x4x8xbf16>
    %73 = vector.shape_cast %72 : vector<1x4x8xbf16> to vector<4x8xbf16>
    %cst_67 = arith.constant dense<0.000000e+00> : vector<4x32xf32>
    %74 = tpu.matmul %73, %64, %cst_67 {dimension_numbers = #tpu.dot_dimension_numbers<[1], [0], [0], [1], [0, 0, 1, 1], [], []>} : vector<4x8xbf16>, vector<8x32xbf16>, vector<4x32xf32> -> vector<4x32xf32>
    %75 = arith.truncf %74 : vector<4x32xf32> to vector<4x32xbf16>
    %c1_68 = arith.constant 1 : index
    %c0_69 = arith.constant 0 : index
    %c0_70 = arith.constant 0 : index
    %76 = vector.load %arg11[%c1_68, %c0_69, %c0_70] : memref<3x32x32xbf16, #tpu.memory_space<vmem>>, vector<1x32x32xbf16>
    %77 = vector.shape_cast %76 : vector<1x32x32xbf16> to vector<32x32xbf16>
    %cst_71 = arith.constant dense<0.000000e+00> : vector<4x32xf32>
    %78 = tpu.matmul %75, %77, %cst_71 {dimension_numbers = #tpu.dot_dimension_numbers<[1], [0], [0], [1], [0, 0, 1, 1], [], []>} : vector<4x32xbf16>, vector<32x32xbf16>, vector<4x32xf32> -> vector<4x32xf32>
    %79 = arith.addf %71, %78 : vector<4x32xf32>
    %c2_72 = arith.constant 2 : index
    %c0_73 = arith.constant 0 : index
    %c0_74 = arith.constant 0 : index
    %80 = vector.load %arg10[%c2_72, %c0_73, %c0_74] : memref<3x4x8xbf16, #tpu.memory_space<vmem>>, vector<1x4x8xbf16>
    %81 = vector.shape_cast %80 : vector<1x4x8xbf16> to vector<4x8xbf16>
    %cst_75 = arith.constant dense<0.000000e+00> : vector<4x32xf32>
    %82 = tpu.matmul %81, %64, %cst_75 {dimension_numbers = #tpu.dot_dimension_numbers<[1], [0], [0], [1], [0, 0, 1, 1], [], []>} : vector<4x8xbf16>, vector<8x32xbf16>, vector<4x32xf32> -> vector<4x32xf32>
    %83 = arith.truncf %82 : vector<4x32xf32> to vector<4x32xbf16>
    %c2_76 = arith.constant 2 : index
    %c0_77 = arith.constant 0 : index
    %c0_78 = arith.constant 0 : index
    %84 = vector.load %arg11[%c2_76, %c0_77, %c0_78] : memref<3x32x32xbf16, #tpu.memory_space<vmem>>, vector<1x32x32xbf16>
    %85 = vector.shape_cast %84 : vector<1x32x32xbf16> to vector<32x32xbf16>
    %cst_79 = arith.constant dense<0.000000e+00> : vector<4x32xf32>
    %86 = tpu.matmul %83, %85, %cst_79 {dimension_numbers = #tpu.dot_dimension_numbers<[1], [0], [0], [1], [0, 0, 1, 1], [], []>} : vector<4x32xbf16>, vector<32x32xbf16>, vector<4x32xf32> -> vector<4x32xf32>
    %87 = arith.addf %79, %86 : vector<4x32xf32>
    %c0_80 = arith.constant 0 : index
    %c0_81 = arith.constant 0 : index
    %88 = vector.load %arg12[%c0_80, %c0_81] : memref<1x32xf32, #tpu.memory_space<vmem>>, vector<1x32xf32>
    %89 = vector.broadcast %88 : vector<1x32xf32> to vector<4x32xf32>
    %90 = arith.mulf %87, %89 : vector<4x32xf32>
    %c0_82 = arith.constant 0 : index
    %c0_83 = arith.constant 0 : index
    %91 = vector.load %arg13[%c0_82, %c0_83] : memref<1x32xf32, #tpu.memory_space<vmem>>, vector<1x32xf32>
    %92 = vector.broadcast %91 : vector<1x32xf32> to vector<4x32xf32>
    %93 = arith.addf %90, %92 : vector<4x32xf32>
    %cst_84 = arith.constant 0.000000e+00 : f32
    %94 = vector.broadcast %cst_84 : f32 to vector<4x32xf32>
    %95 = arith.maximumf %93, %94 : vector<4x32xf32>
    %96 = arith.truncf %95 : vector<4x32xf32> to vector<4x32xbf16>
    %97 = arith.extf %96 : vector<4x32xbf16> to vector<4x32xf32>
    %c0_85 = arith.constant 0 : index
    %c0_86 = arith.constant 0 : index
    %98 = vector.load %arg1[%c0_85, %c0_86] : memref<4x1xf32, #tpu.memory_space<vmem>>, vector<4x1xf32>
    %99 = vector.broadcast %98 : vector<4x1xf32> to vector<4x32xf32>
    %100 = arith.mulf %97, %99 : vector<4x32xf32>
    %101 = arith.truncf %100 : vector<4x32xf32> to vector<4x32xbf16>
    %c0_87 = arith.constant 0 : index
    %c0_88 = arith.constant 0 : index
    %102 = vector.load %arg14[%c0_87, %c0_88] : memref<32x48xbf16, #tpu.memory_space<vmem>>, vector<32x48xbf16>
    %cst_89 = arith.constant dense<0.000000e+00> : vector<4x48xf32>
    %103 = tpu.matmul %101, %102, %cst_89 {dimension_numbers = #tpu.dot_dimension_numbers<[1], [0], [0], [1], [0, 0, 1, 1], [], []>} : vector<4x32xbf16>, vector<32x48xbf16>, vector<4x48xf32> -> vector<4x48xf32>
    %c0_90 = arith.constant 0 : index
    %c0_91 = arith.constant 0 : index
    %104 = vector.load %arg16[%c0_90, %c0_91] : memref<1x48xf32, #tpu.memory_space<vmem>>, vector<1x48xf32>
    %105 = vector.broadcast %104 : vector<1x48xf32> to vector<4x48xf32>
    %106 = arith.addf %103, %105 : vector<4x48xf32>
    %c0_92 = arith.constant 0 : index
    %c0_93 = arith.constant 0 : index
    %107 = vector.load %arg26[%c0_92, %c0_93] : memref<4x48xf32, #tpu.memory_space<vmem>>, vector<4x48xf32>
    tpu.vector_store %arg26[%c0_92, %c0_93], %106 {strides = array<i32>} : memref<4x48xf32, #tpu.memory_space<vmem>>, vector<4x48xf32>,
    %cst_94 = arith.constant 0.000000e+00 : f32
    %108 = vector.broadcast %cst_94 : f32 to vector<2x16xf32>
    %c0_i32 = arith.constant 0 : i32
    %c2_i32 = arith.constant 2 : i32
    %109 = arith.muli %c0_i32, %c2_i32 : i32
    %110 = tpu.assume_multiple %109, 2 : i32
    %111 = arith.index_cast %110 : i32 to index
    %c0_95 = arith.constant 0 : index
    %112 = vector.load %arg26[%111, %c0_95] : memref<4x48xf32, #tpu.memory_space<vmem>>, vector<2x48xf32>
    %113 = arith.truncf %108 : vector<2x16xf32> to vector<2x16xbf16>
    %c0_96 = arith.constant 0 : index
    %c0_97 = arith.constant 0 : index
    %114 = vector.load %arg15[%c0_96, %c0_97] : memref<16x48xbf16, #tpu.memory_space<vmem>>, vector<16x48xbf16>
    %cst_98 = arith.constant dense<0.000000e+00> : vector<2x48xf32>
    %115 = tpu.matmul %113, %114, %cst_98 {dimension_numbers = #tpu.dot_dimension_numbers<[1], [0], [0], [1], [0, 0, 1, 1], [], []>} : vector<2x16xbf16>, vector<16x48xbf16>, vector<2x48xf32> -> vector<2x48xf32>
    %c0_99 = arith.constant 0 : index
    %c0_100 = arith.constant 0 : index
    %116 = vector.load %arg17[%c0_99, %c0_100] : memref<1x48xf32, #tpu.memory_space<vmem>>, vector<1x48xf32>
    %117 = vector.broadcast %116 : vector<1x48xf32> to vector<2x48xf32>
    %118 = arith.addf %115, %117 : vector<2x48xf32>
    %119 = vector.extract_strided_slice %112 {offsets = [0, 0], sizes = [2, 16], strides = [1, 1]} : vector<2x48xf32> to vector<2x16xf32>
    %120 = vector.extract_strided_slice %118 {offsets = [0, 0], sizes = [2, 16], strides = [1, 1]} : vector<2x48xf32> to vector<2x16xf32>
    %121 = arith.addf %119, %120 : vector<2x16xf32>
    %122 = arith.negf %121 : vector<2x16xf32>
    %123 = math.exp %122 : vector<2x16xf32>
    %cst_101 = arith.constant 1.000000e+00 : f32
    %124 = vector.broadcast %cst_101 : f32 to vector<2x16xf32>
    %125 = arith.addf %124, %123 : vector<2x16xf32>
    %126 = arith.divf %124, %125 : vector<2x16xf32>
    %127 = vector.extract_strided_slice %112 {offsets = [0, 16], sizes = [2, 16], strides = [1, 1]} : vector<2x48xf32> to vector<2x16xf32>
    %128 = vector.extract_strided_slice %118 {offsets = [0, 16], sizes = [2, 16], strides = [1, 1]} : vector<2x48xf32> to vector<2x16xf32>
    %129 = arith.addf %127, %128 : vector<2x16xf32>
    %130 = arith.negf %129 : vector<2x16xf32>
    %131 = math.exp %130 : vector<2x16xf32>
    %cst_102 = arith.constant 1.000000e+00 : f32
    %132 = vector.broadcast %cst_102 : f32 to vector<2x16xf32>
    %133 = arith.addf %132, %131 : vector<2x16xf32>
    %134 = arith.divf %132, %133 : vector<2x16xf32>
    %135 = vector.extract_strided_slice %112 {offsets = [0, 32], sizes = [2, 16], strides = [1, 1]} : vector<2x48xf32> to vector<2x16xf32>
    %136 = vector.extract_strided_slice %118 {offsets = [0, 32], sizes = [2, 16], strides = [1, 1]} : vector<2x48xf32> to vector<2x16xf32>
    %137 = arith.mulf %126, %136 : vector<2x16xf32>
    %138 = arith.addf %135, %137 : vector<2x16xf32>
    %139 = math.tanh %138 : vector<2x16xf32>
    %cst_103 = arith.constant 1.000000e+00 : f32
    %140 = vector.broadcast %cst_103 : f32 to vector<2x16xf32>
    %141 = arith.subf %140, %134 : vector<2x16xf32>
    %142 = arith.mulf %141, %139 : vector<2x16xf32>
    %143 = arith.mulf %134, %108 : vector<2x16xf32>
    %144 = arith.addf %142, %143 : vector<2x16xf32>
    %c1_i32 = arith.constant 1 : i32
    %c2_i32_104 = arith.constant 2 : i32
    %145 = arith.muli %c1_i32, %c2_i32_104 : i32
    %146 = tpu.assume_multiple %145, 2 : i32
    %147 = arith.index_cast %146 : i32 to index
    %c0_105 = arith.constant 0 : index
    %148 = vector.load %arg26[%147, %c0_105] : memref<4x48xf32, #tpu.memory_space<vmem>>, vector<2x48xf32>
    %149 = arith.truncf %144 : vector<2x16xf32> to vector<2x16xbf16>
    %c0_106 = arith.constant 0 : index
    %c0_107 = arith.constant 0 : index
    %150 = vector.load %arg15[%c0_106, %c0_107] : memref<16x48xbf16, #tpu.memory_space<vmem>>, vector<16x48xbf16>
    %cst_108 = arith.constant dense<0.000000e+00> : vector<2x48xf32>
    %151 = tpu.matmul %149, %150, %cst_108 {dimension_numbers = #tpu.dot_dimension_numbers<[1], [0], [0], [1], [0, 0, 1, 1], [], []>} : vector<2x16xbf16>, vector<16x48xbf16>, vector<2x48xf32> -> vector<2x48xf32>
    %c0_109 = arith.constant 0 : index
    %c0_110 = arith.constant 0 : index
    %152 = vector.load %arg17[%c0_109, %c0_110] : memref<1x48xf32, #tpu.memory_space<vmem>>, vector<1x48xf32>
    %153 = vector.broadcast %152 : vector<1x48xf32> to vector<2x48xf32>
    %154 = arith.addf %151, %153 : vector<2x48xf32>
    %155 = vector.extract_strided_slice %148 {offsets = [0, 0], sizes = [2, 16], strides = [1, 1]} : vector<2x48xf32> to vector<2x16xf32>
    %156 = vector.extract_strided_slice %154 {offsets = [0, 0], sizes = [2, 16], strides = [1, 1]} : vector<2x48xf32> to vector<2x16xf32>
    %157 = arith.addf %155, %156 : vector<2x16xf32>
    %158 = arith.negf %157 : vector<2x16xf32>
    %159 = math.exp %158 : vector<2x16xf32>
    %cst_111 = arith.constant 1.000000e+00 : f32
    %160 = vector.broadcast %cst_111 : f32 to vector<2x16xf32>
    %161 = arith.addf %160, %159 : vector<2x16xf32>
    %162 = arith.divf %160, %161 : vector<2x16xf32>
    %163 = vector.extract_strided_slice %148 {offsets = [0, 16], sizes = [2, 16], strides = [1, 1]} : vector<2x48xf32> to vector<2x16xf32>
    %164 = vector.extract_strided_slice %154 {offsets = [0, 16], sizes = [2, 16], strides = [1, 1]} : vector<2x48xf32> to vector<2x16xf32>
    %165 = arith.addf %163, %164 : vector<2x16xf32>
    %166 = arith.negf %165 : vector<2x16xf32>
    %167 = math.exp %166 : vector<2x16xf32>
    %cst_112 = arith.constant 1.000000e+00 : f32
    %168 = vector.broadcast %cst_112 : f32 to vector<2x16xf32>
    %169 = arith.addf %168, %167 : vector<2x16xf32>
    %170 = arith.divf %168, %169 : vector<2x16xf32>
    %171 = vector.extract_strided_slice %148 {offsets = [0, 32], sizes = [2, 16], strides = [1, 1]} : vector<2x48xf32> to vector<2x16xf32>
    %172 = vector.extract_strided_slice %154 {offsets = [0, 32], sizes = [2, 16], strides = [1, 1]} : vector<2x48xf32> to vector<2x16xf32>
    %173 = arith.mulf %162, %172 : vector<2x16xf32>
    %174 = arith.addf %171, %173 : vector<2x16xf32>
    %175 = math.tanh %174 : vector<2x16xf32>
    %cst_113 = arith.constant 1.000000e+00 : f32
    %176 = vector.broadcast %cst_113 : f32 to vector<2x16xf32>
    %177 = arith.subf %176, %170 : vector<2x16xf32>
    %178 = arith.mulf %177, %175 : vector<2x16xf32>
    %179 = arith.mulf %170, %144 : vector<2x16xf32>
    %180 = arith.addf %178, %179 : vector<2x16xf32>
    %c2_i32_114 = arith.constant 2 : i32
    %181 = arith.truncf %180 : vector<2x16xf32> to vector<2x16xbf16>
    %c0_115 = arith.constant 0 : index
    %c0_116 = arith.constant 0 : index
    %182 = vector.load %arg18[%c0_115, %c0_116] : memref<16x16xbf16, #tpu.memory_space<vmem>>, vector<16x16xbf16>
    %cst_117 = arith.constant dense<0.000000e+00> : vector<2x16xf32>
    %183 = tpu.matmul %181, %182, %cst_117 {dimension_numbers = #tpu.dot_dimension_numbers<[1], [0], [0], [1], [0, 0, 1, 1], [], []>} : vector<2x16xbf16>, vector<16x16xbf16>, vector<2x16xf32> -> vector<2x16xf32>
    %c0_118 = arith.constant 0 : index
    %c0_119 = arith.constant 0 : index
    %184 = vector.load %arg19[%c0_118, %c0_119] : memref<1x16xf32, #tpu.memory_space<vmem>>, vector<1x16xf32>
    %185 = vector.broadcast %184 : vector<1x16xf32> to vector<2x16xf32>
    %186 = arith.addf %183, %185 : vector<2x16xf32>
    %187 = arith.truncf %186 : vector<2x16xf32> to vector<2x16xbf16>
    %c0_120 = arith.constant 0 : index
    %c0_121 = arith.constant 0 : index
    %188 = vector.load %arg20[%c0_120, %c0_121] : memref<16x32xbf16, #tpu.memory_space<vmem>>, vector<16x32xbf16>
    %cst_122 = arith.constant dense<0.000000e+00> : vector<2x32xf32>
    %189 = tpu.matmul %187, %188, %cst_122 {dimension_numbers = #tpu.dot_dimension_numbers<[1], [0], [0], [1], [0, 0, 1, 1], [], []>} : vector<2x16xbf16>, vector<16x32xbf16>, vector<2x32xf32> -> vector<2x32xf32>
    %190 = arith.truncf %189 : vector<2x32xf32> to vector<2x32xbf16>
    %c0_123 = arith.constant 0 : index
    %c0_124 = arith.constant 0 : index
    %191 = vector.load %arg21[%c0_123, %c0_124] : memref<32x8xbf16, #tpu.memory_space<vmem>>, vector<32x8xbf16>
    %cst_125 = arith.constant dense<0.000000e+00> : vector<2x8xf32>
    %192 = tpu.matmul %190, %191, %cst_125 {dimension_numbers = #tpu.dot_dimension_numbers<[1], [0], [0], [1], [0, 0, 1, 1], [], []>} : vector<2x32xbf16>, vector<32x8xbf16>, vector<2x8xf32> -> vector<2x8xf32>
    %cst_126 = arith.constant 0.176776692 : f32
    %193 = vector.broadcast %cst_126 : f32 to vector<2x8xf32>
    %194 = arith.mulf %192, %193 : vector<2x8xf32>
    %cst_127 = arith.constant dense<0xFF800000> : vector<2xf32>
    %195 = vector.multi_reduction <maximumf>, %194, %cst_127 [1] : vector<2x8xf32> to vector<2xf32>
    %196 = vector.shape_cast %195 : vector<2xf32> to vector<2x1xf32>
    %197 = vector.broadcast %196 : vector<2x1xf32> to vector<2x8xf32>
    %198 = arith.subf %194, %197 : vector<2x8xf32>
    %199 = math.exp %198 : vector<2x8xf32>
    %cst_128 = arith.constant dense<0.000000e+00> : vector<2xf32>
    %200 = vector.multi_reduction <add>, %199, %cst_128 [1] : vector<2x8xf32> to vector<2xf32>
    %201 = vector.shape_cast %200 : vector<2xf32> to vector<2x1xf32>
    %202 = tpu.reciprocal %201 {approx = true} : vector<2x1xf32> -> vector<2x1xf32>
    %203 = vector.broadcast %202 : vector<2x1xf32> to vector<2x8xf32>
    %204 = arith.mulf %199, %203 : vector<2x8xf32>
    %205 = arith.truncf %204 : vector<2x8xf32> to vector<2x8xbf16>
    %c0_129 = arith.constant 0 : index
    %c0_130 = arith.constant 0 : index
    %206 = vector.load %arg22[%c0_129, %c0_130] : memref<8x32xbf16, #tpu.memory_space<vmem>>, vector<8x32xbf16>
    %cst_131 = arith.constant dense<0.000000e+00> : vector<2x32xf32>
    %207 = tpu.matmul %205, %206, %cst_131 {dimension_numbers = #tpu.dot_dimension_numbers<[1], [0], [0], [1], [0, 0, 1, 1], [], []>} : vector<2x8xbf16>, vector<8x32xbf16>, vector<2x32xf32> -> vector<2x32xf32>
    %208 = arith.truncf %207 : vector<2x32xf32> to vector<2x32xbf16>
    %c0_132 = arith.constant 0 : index
    %c0_133 = arith.constant 0 : index
    %209 = vector.load %arg23[%c0_132, %c0_133] : memref<32x16xbf16, #tpu.memory_space<vmem>>, vector<32x16xbf16>
    %cst_134 = arith.constant dense<0.000000e+00> : vector<2x16xf32>
    %210 = tpu.matmul %208, %209, %cst_134 {dimension_numbers = #tpu.dot_dimension_numbers<[1], [0], [0], [1], [0, 0, 1, 1], [], []>} : vector<2x32xbf16>, vector<32x16xbf16>, vector<2x16xf32> -> vector<2x16xf32>
    %c0_135 = arith.constant 0 : index
    %c0_136 = arith.constant 0 : index
    %211 = vector.load %arg24[%c0_135, %c0_136] : memref<1x16xf32, #tpu.memory_space<vmem>>, vector<1x16xf32>
    %212 = vector.broadcast %211 : vector<1x16xf32> to vector<2x16xf32>
    %213 = arith.addf %210, %212 : vector<2x16xf32>
    %c0_137 = arith.constant 0 : index
    %c0_138 = arith.constant 0 : index
    %214 = vector.load %arg25[%c0_137, %c0_138] : memref<2x16xf32, #tpu.memory_space<vmem>>, vector<2x16xf32>
    tpu.vector_store %arg25[%c0_137, %c0_138], %213 {strides = array<i32>} : memref<2x16xf32, #tpu.memory_space<vmem>>, vector<2x16xf32>,
    return
  }
}

</mosaic_0001>

<bundles_post_ra>
// kernel: tpu_custom_call.1
= control target key start
LH: loop header
LB: loop body
LE: loop exit
PB: predicated region body
PF: predicated region fallthrough
CT: control target
= control target key end

     0   :  { %s2428_s0 = inlined_call_operand.hbm [shape: bf16[32,64], index: 0, kind: input, shape index: {}]   ;;  %s2429_s1 = inlined_call_operand.vmem [shape: f32[4,1], index: 1, kind: input, shape index: {}]   ;;  %s2430_s2 = inlined_call_operand.hbm [shape: bf16[3,16,32], index: 2, kind: input, shape index: {}]   ;;  %s2431_s3 = inlined_call_operand.vmem [shape: bf16[3,64,64], index: 3, kind: input, shape index: {}]   ;;  %s2432_s4 = inlined_call_operand.hbm [shape: f32[1,64], index: 4, kind: input, shape index: {}]   ;;  %s2433_s5 = inlined_call_operand.hbm [shape: f32[1,64], index: 5, kind: input, shape index: {}]   ;;  %s2434_s6 = inlined_call_operand.hbm [shape: bf16[3,8,16], index: 6, kind: input, shape index: {}]   ;;  %s2435_s7 = inlined_call_operand.vmem [shape: bf16[3,64,32], index: 7, kind: input, shape index: {}]   ;;  %s2436_s8 = inlined_call_operand.hbm [shape: f32[1,32], index: 8, kind: input, shape index: {}]   ;;  %s2437_s9 = inlined_call_operand.hbm [shape: f32[1,32], index: 9, kind: input, shape index: {}]   ;;  %s2438_s10 = inlined_call_operand.hbm [shape: bf16[3,4,8], index: 10, kind: input, shape index: {}]   ;;  %s2439_s11 = inlined_call_operand.vmem [shape: bf16[3,32,32], index: 11, kind: input, shape index: {}]   ;;  %s2440_s12 = inlined_call_operand.hbm [shape: f32[1,32], index: 12, kind: input, shape index: {}]   ;;  %s2441_s13 = inlined_call_operand.hbm [shape: f32[1,32], index: 13, kind: input, shape index: {}]   ;;  %s2442_s14 = inlined_call_operand.hbm [shape: bf16[32,48], index: 14, kind: input, shape index: {}]   ;;  %s2443_s15 = inlined_call_operand.hbm [shape: bf16[16,48], index: 15, kind: input, shape index: {}]   ;;  %s2444_s16 = inlined_call_operand.vmem [shape: f32[1,48], index: 16, kind: input, shape index: {}]   ;;  %s2445_s17 = inlined_call_operand.vmem [shape: f32[1,48], index: 17, kind: input, shape index: {}]   ;;  %s2446_s18 = inlined_call_operand.hbm [shape: bf16[16,16], index: 18, kind: input, shape index: {}]   ;;  %s2447_s19 = inlined_call_operand.hbm [shape: f32[1,16], index: 19, kind: input, shape index: {}]   ;;  %s2448_s20 = inlined_call_operand.hbm [shape: bf16[16,32], index: 20, kind: input, shape index: {}]   ;;  %s2449_s21 = inlined_call_operand.vmem [shape: bf16[32,8], index: 21, kind: input, shape index: {}]   ;;  %s2450_s22 = inlined_call_operand.vmem [shape: bf16[8,32], index: 22, kind: input, shape index: {}]   ;;  %s2451_s23 = inlined_call_operand.vmem [shape: bf16[32,16], index: 23, kind: input, shape index: {}]   ;;  %s2452_s24 = inlined_call_operand.vmem [shape: f32[1,16], index: 24, kind: input, shape index: {}]   ;;  %s2453_s25 = inlined_call_operand.hbm [shape: f32[2,16], index: 25, kind: output, shape index: {}]  }
   0x1   :  { %2458 = sst [smem:[#allocation37_spill]] %s2428_s0 }
   0x2   :  { %2459 = sst [smem:[#allocation38_spill]] %s2429_s1 }
   0x3   :  { %2460 = sst [smem:[#allocation39_spill]] %s2430_s2 }
   0x4   :  { %2461 = sst [smem:[#allocation40_spill]] %s2431_s3 }
   0x5   :  { %2462 = sst [smem:[#allocation41_spill]] %s2432_s4 }
   0x6   :  { %2463 = sst [smem:[#allocation42_spill]] %s2433_s5 }
   0x7   :  { %2464 = sst [smem:[#allocation43_spill]] %s2434_s6 }
   0x8   :  { %2465 = sst [smem:[#allocation44_spill]] %s2435_s7 }
   0x9   :  { %2466 = sst [smem:[#allocation45_spill]] %s2436_s8 }
   0xa   :  { %2467 = sst [smem:[#allocation46_spill]] %s2437_s9 }
   0xb   :  { %2468 = sst [smem:[#allocation47_spill]] %s2453_s25 }
   0xc   :  { %30 = vsyncpa [#allocation4], 0 }
   0xd   :  { %31 = vsyncpa [#allocation7], 0 }
   0xe   :  { %32 = vsyncpa [#allocation10], 0 }
   0xf   :  { %33 = vsyncpa [#allocation13], 0 }
  0x10   :  { %34 = vsyncpa [#allocation16], 0 }
  0x11   :  { %35 = vsyncpa [#allocation19], 0 }
  0x12   :  { %36 = vsyncpa [#allocation22], 0 }
  0x13   :  { %37 = vsyncpa [#allocation25], 0 }
  0x14   :  { %38 = vsyncpa [#allocation5], 0  ;;  %s2469_s6 = sld [smem:[#allocation39_spill]]  ;;  %s2052_s7 = smov [#allocation6]  }
  0x15   :  { %s60_s3 = sshll.u32 %s2052_s7, 4  ;;  %s2470_s8 = sld [smem:[#allocation42_spill]]  ;;  %s61_s3 = int_to_ptr.vmem [resolvable:$true] %s60_s3 }
  0x16   :  { %s2456_s4 = smov 64   ;;  %s2054_s28 = smov 4  }
  0x17   :  { %s2055_s9 = smov [#allocation9]   ;;  %s2471_s2 = sld [smem:[#allocation45_spill]] }
  0x18   :  { %s87_s5 = sshll.u32 %s2055_s9, 4  ;;  %s132_s26 = sshll.u32 %s2438_s10, 4  ;;  %s88_s5 = int_to_ptr.vmem [resolvable:$true] %s87_s5  ;;  %s133_s26 = int_to_ptr.hbm [resolvable:$true] %s132_s26 }
  0x19   :  { %s2056_s1 = smov [#allocation12]   ;;  %s2058_s9 = smov 32  }
  0x1a   :  { %s58_s30 = sshll.u32 %s2469_s6, 4  ;;  %s2060_s25 = smov [#allocation18]   ;;  %s59_s30 = int_to_ptr.hbm [resolvable:$true] %s58_s30 }
  0x1b   :  { %s85_s27 = sshll.u32 %s2470_s8, 4  ;;  %s113_s8 = sshll.u32 %s2056_s1, 4  ;;  %s86_s27 = int_to_ptr.hbm [resolvable:$true] %s85_s27  ;;  %s114_s8 = int_to_ptr.vmem [resolvable:$true] %s113_s8 }
  0x1c   :  { %66 = dma.hbm_to_vmem [thread:$0]  %s59_s30, 384, %s61_s3, [#allocation7], %s2456_s4, %s2456_s4, %s2054_s28  }
  0x1d   :  { %s111_s6 = sshll.u32 %s2471_s2, 4  ;;  %s2057_s30 = smov [#allocation15]   ;;  %s112_s6 = int_to_ptr.hbm [resolvable:$true] %s111_s6 }
  0x1e   :  { %90 = dma.hbm_to_vmem [thread:$0]  %s86_s27, 16, %s88_s5, [#allocation10]  }
  0x1f   :  { %116 = dma.hbm_to_vmem [thread:$0]  %s112_s6, 16, %s114_s8, [#allocation13]  }
  0x20   :  { %s134_s3 = sshll.u32 %s2057_s30, 4  ;;  %s2059_s4 = smov 2   ;;  %s135_s3 = int_to_ptr.vmem [resolvable:$true] %s134_s3 }
  0x21   :  { %140 = dma.hbm_to_vmem [thread:$0]  %s133_s26, 96, %s135_s3, [#allocation16], %s2058_s9, %s2058_s9, %s2059_s4  }
  0x22   :  { %s159_s27 = sshll.u32 %s2441_s13, 4  ;;  %s161_s10 = sshll.u32 %s2060_s25, 4  ;;  %s160_s27 = int_to_ptr.hbm [resolvable:$true] %s159_s27  ;;  %s162_s10 = int_to_ptr.vmem [resolvable:$true] %s161_s10 }
  0x23   :  { %s182_s6 = sshll.u32 %s2443_s15, 4  ;;  %s2061_s7 = smov [#allocation21]   ;;  %s183_s6 = int_to_ptr.hbm [resolvable:$true] %s182_s6 }
  0x24   :  { %164 = dma.hbm_to_vmem [thread:$0]  %s160_s27, 16, %s162_s10, [#allocation19]  }
  0x25   :  { %s184_s1 = sshll.u32 %s2061_s7, 4  ;;  %s213_s4 = sshll.u32 %s2447_s19, 4  ;;  %s185_s1 = int_to_ptr.vmem [resolvable:$true] %s184_s1  ;;  %s214_s4 = int_to_ptr.hbm [resolvable:$true] %s213_s4 }
  0x26   :  { %s2472_s13 = smov 64   ;;  %s2473_s0 = sld [smem:[#allocation37_spill]] }
  0x27   :  { %190 = dma.hbm_to_vmem [thread:$0]  %s183_s6, 128, %s185_s1, [#allocation22], %s2472_s13, %s2472_s13, %s2054_s28  }
  0x28   :  { %s2062_s25 = smov [#allocation24]   ;;  %s2063_s27 = smov [#allocation3]  }
  0x29   :  { %s215_s15 = sshll.u32 %s2062_s25, 4  ;;  %s45_s10 = sshll.u32 %s2063_s27, 4  ;;  %s216_s15 = int_to_ptr.vmem [resolvable:$true] %s215_s15  ;;  %s46_s10 = int_to_ptr.vmem [resolvable:$true] %s45_s10 }
  0x2a   :  { %218 = dma.hbm_to_vmem [thread:$0]  %s214_s4, 16, %s216_s15, [#allocation25]  }
  0x2b   :  { %s2474_s19 = sld [smem:[#allocation41_spill]]  ;;  %s2064_s26 = smov [#allocation8]  }
  0x2c   :  { %s43_s29 = sshll.u32 %s2473_s0, 4  ;;  %s2475_s8 = sld [smem:[#allocation43_spill]]  ;;  %s44_s29 = int_to_ptr.hbm [resolvable:$true] %s43_s29 }
  0x2d   :  { %51 = dma.hbm_to_vmem [thread:$0]  %s44_s29, 256, %s46_s10, [#allocation4], %s2472_s13, %s2472_s13, %s2054_s28  }
  0x2e   :  { %s76_s3 = sshll.u32 %s2064_s26, 4  ;;  %s2065_s4 = smov [#allocation11]   ;;  %s77_s3 = int_to_ptr.vmem [resolvable:$true] %s76_s3 }
  0x2f   :  { %s97_s0 = sshll.u32 %s2065_s4, 4  ;;  %s2476_s27 = sld [smem:[#allocation46_spill]]  ;;  %s98_s0 = int_to_ptr.vmem [resolvable:$true] %s97_s0 }
  0x30   :  { %s148_s2 = sshll.u32 %s2440_s12, 4  ;;  %s2068_s25 = smov [#allocation20]   ;;  %s149_s2 = int_to_ptr.hbm [resolvable:$true] %s148_s2 }
  0x31   :  { %s74_s7 = sshll.u32 %s2474_s19, 4  ;;  %s2066_s19 = smov [#allocation14]   ;;  %s75_s7 = int_to_ptr.hbm [resolvable:$true] %s74_s7 }
  0x32   :  { %s95_s30 = sshll.u32 %s2475_s8, 4  ;;  %s124_s6 = sshll.u32 %s2066_s19, 4  ;;  %s96_s30 = int_to_ptr.hbm [resolvable:$true] %s95_s30  ;;  %s125_s6 = int_to_ptr.vmem [resolvable:$true] %s124_s6 }
  0x33   :  { %79 = dma.hbm_to_vmem [thread:$0]  %s75_s7, 16, %s77_s3, [#allocation7]  }
  0x34   :  { %103 = dma.hbm_to_vmem [thread:$0]  %s96_s30, 192, %s98_s0, [#allocation10], %s2472_s13, %s2472_s13, %s2054_s28  }
  0x35   :  { %s122_s5 = sshll.u32 %s2476_s27, 4  ;;  %s2067_s7 = smov [#allocation17]   ;;  %s123_s5 = int_to_ptr.hbm [resolvable:$true] %s122_s5 }
  0x36   :  { %127 = dma.hbm_to_vmem [thread:$0]  %s123_s5, 16, %s125_s6, [#allocation13]  }
  0x37   :  { %s150_s1 = sshll.u32 %s2067_s7, 4  ;;  %s169_s3 = sshll.u32 %s2442_s14, 4  ;;  %s151_s1 = int_to_ptr.vmem [resolvable:$true] %s150_s1  ;;  %s170_s3 = int_to_ptr.hbm [resolvable:$true] %s169_s3 }
  0x38   :  { %153 = dma.hbm_to_vmem [thread:$0]  %s149_s2, 16, %s151_s1, [#allocation16]  }
  0x39   :  { %s199_s0 = sshll.u32 %s2446_s18, 4  ;;  %s171_s12 = sshll.u32 %s2068_s25, 4  ;;  %s200_s0 = int_to_ptr.hbm [resolvable:$true] %s199_s0  ;;  %s172_s12 = int_to_ptr.vmem [resolvable:$true] %s171_s12 }
  0x3a   :  { %177 = dma.hbm_to_vmem [thread:$0]  %s170_s3, 256, %s172_s12, [#allocation19], %s2472_s13, %s2472_s13, %s2054_s28  }
  0x3b   :  { %s2069_s15 = smov [#allocation23]   ;;  %s223_s14 = sshll.u32 %s2448_s20, 4  ;;  %s224_s14 = int_to_ptr.hbm [resolvable:$true] %s223_s14 }
  0x3c   :  { %s201_s27 = sshll.u32 %s2069_s15, 4  ;;  %s2070_s18 = smov [#allocation26]   ;;  %s202_s27 = int_to_ptr.vmem [resolvable:$true] %s201_s27 }
  0x3d   :  { %207 = dma.hbm_to_vmem [thread:$0]  %s200_s0, 128, %s202_s27, [#allocation22], %s2472_s13, %s2472_s13, %s2054_s28  }
  0x3e   :  { %s225_s10 = sshll.u32 %s2070_s18, 4  ;;  %s226_s10 = int_to_ptr.vmem [resolvable:$true] %s225_s10 }
  0x3f   :  { %231 = dma.hbm_to_vmem [thread:$0]  %s224_s14, 128, %s226_s10, [#allocation25], %s2472_s13, %s2472_s13, %s2054_s28  }
  0x40   :  { %2034 = dma.done.wait [#allocation4], 256  }
  0x41   :  { %2035 = vsyncadd [#allocation4], 4294967040 }
  0x42   :  { %2036 = dma.done.wait [#allocation7], 400  }
  0x43   :  { %2037 = vsyncadd [#allocation7], 4294966896 }
  0x44   :  { %2038 = dma.done.wait [#allocation10], 208  }
  0x45   :  { %2039 = vsyncadd [#allocation10], 4294967088 }
  0x46   :  { %2040 = dma.done.wait [#allocation13], 32  }
  0x47   :  { %2041 = vsyncadd [#allocation13], 4294967264 }
  0x48   :  { %2042 = dma.done.wait [#allocation16], 112  }
  0x49   :  { %2043 = vsyncadd [#allocation16], 4294967184 }
  0x4a   :  { %2044 = dma.done.wait [#allocation19], 272  }
  0x4b   :  { %2045 = vsyncadd [#allocation19], 4294967024 }
  0x4c   :  { %2046 = dma.done.wait [#allocation22], 256  }
  0x4d   :  { %2047 = vsyncadd [#allocation22], 4294967040 }
  0x4e   :  { %2048 = dma.done.wait [#allocation25], 144  }
  0x4f   :  { %2049 = vsyncadd [#allocation25], 4294967152  ;;  %v1557_v0 = vld [vmem:[#allocation3 + $0x8] sm:$0xff]  ;;  %v1556_v1 = vld [vmem:[#allocation3] sm:$0xff]  ;;  %s2477_s13 = sld [smem:[#allocation40_spill]]  ;;  %vm324_vm0 = vcmask 261120  }
  0x50   :  { %334 = vmatpush.bf16.msra.mxu0 %v1557_v0  ;;  %368 = vmatpush.bf16.msra.mxu1 %v1557_v0  ;;  %v1558_v4 = vld [vmem:[#allocation6] sm:$0xff]  ;;  %v1563_v5 = vld [vmem:[#allocation6 + $0x8] sm:$0xff]  ;;  %v1568_v6 = vld [vmem:[#allocation6 + $0x10] sm:$0xff]  ;;  %vm410_vm1 = vcmask 523264   ;;  %s2478_s19 = sld [smem:[#allocation44_spill]]  ;;  %vm563_vm2 = vcmask 130048  }
  0x51   :  { %v1624_v31 = vld [vmem:[#allocation8] ss:$0 sm:$0xff]  ;;  %v1625_v38 = vld [vmem:[#allocation9] ss:$0 sm:$0xff]  ;;  %v562_v51 = vld [vmem:[#allocation11] sm:$0xf] }
  0x52   :  { %v590_v52 = vld [vmem:[#allocation11 + $0x4] sm:$0xf]  ;;  %v698_v53 = vld [vmem:[#allocation11 + $0x8] sm:$0xf]  ;;  %vm783_vm3 = vcmask 1043456   ;;  %vm779_vm4 = vcmask 64512  }
  0x53   :  { %s2479_s5 = sld [smem:[#allocation38_spill]]  ;;  %s2072_s14 = smov 96   ;;  %vm995_vm5 = vcmask 388096   ;;  %vm1217_vm14 = vcmask 58368   ;;  %vm1287_vm15 = vcmask 123904  }
  0x54   :  { %335 = vmatpush.bf16.msra.mxu0 %v1556_v1  ;;  %369 = vmatpush.bf16.msra.mxu1 %v1556_v1  ;;  %s2074_s8 = smov [#allocation27]   ;;  %s2480_s30 = sld [smem:[#allocation47_spill]] }
  0x55   :  { %v1567_v2 = vld [vmem:[%s2477_s13 + $0x38] sm:$0xff]  ;;  %v1566_v7 = vld [vmem:[%s2477_s13 + $0x30] sm:$0xff]  ;;  %v1565_v9 = vld [vmem:[%s2477_s13 + $0x28] sm:$0xff]  ;;  %s1294_s26 = sshll.u32 %s2074_s8, 4  ;;  %s1295_s26 = int_to_ptr.vmem [resolvable:$true] %s1294_s26 }
  0x56   :  { %v1562_v3 = vld [vmem:[%s2477_s13 + $0x18] sm:$0xff]  ;;  %418 = vmatpush.bf16.msra.mxu2 %v1567_v2  ;;  %v1561_v8 = vld [vmem:[%s2477_s13 + $0x10] sm:$0xff]  ;;  %v1560_v10 = vld [vmem:[%s2477_s13 + $0x8] sm:$0xff] }
  0x57   :  { %459 = vmatpush.bf16.msra.mxu3 %v1562_v3  ;;  %1325 = vmatmul.msk.bf16.vlgmr.msra.gmra.mxu0 %vm324_vm0, %v1558_v4  ;;  %v1564_v11 = vld [vmem:[%s2477_s13 + $0x20] sm:$0xff]  ;;  %v1572_v13 = vld [vmem:[%s2477_s13 + $0x58] sm:$0xff]  ;;  %v1571_v14 = vld [vmem:[%s2477_s13 + $0x50] sm:$0xff] }
  0x58   :  { %486 = vmatpush.bf16.msrb.mxu0 %v1557_v0  ;;  %1330 = vmatmul.msk.bf16.vlgmr.msra.gmra.mxu1 %vm324_vm0, %v1563_v5  ;;  %v1559_v12 = vld [vmem:[%s2477_s13] sm:$0xff]  ;;  %v1570_v15 = vld [vmem:[%s2477_s13 + $0x48] sm:$0xff]  ;;  %v1580_v34 = vld [vmem:[%s2478_s19 + $0x38] sm:$0xff] }
  0x59   :  { %535 = vmatpush.bf16.msrb.mxu1 %v1572_v13  ;;  %v1569_v16 = vld [vmem:[%s2477_s13 + $0x40] sm:$0xff]  ;;  %v1576_v35 = vld [vmem:[%s2478_s19 + $0x18] sm:$0xff]  ;;  %v1579_v40 = vld [vmem:[%s2478_s19 + $0x30] sm:$0xff] }
  0x5a   :  { %419 = vmatpush.bf16.msra.mxu2 %v1566_v7  ;;  %v1575_v41 = vld [vmem:[%s2478_s19 + $0x10] sm:$0xff]  ;;  %v1578_v45 = vld [vmem:[%s2478_s19 + $0x28] sm:$0xff]  ;;  %v1577_v54 = vld [vmem:[%s2478_s19 + $0x20] sm:$0xff]  ;;  %s1296_s0 = sshll.u32 %s2480_s30, 4  ;;  %s1297_s0 = int_to_ptr.hbm [resolvable:$true] %s1296_s0 }
  0x5b   :  { %460 = vmatpush.bf16.msra.mxu3 %v1561_v8  ;;  %v1574_v46 = vld [vmem:[%s2478_s19 + $0x8] sm:$0xff]  ;;  %v1573_v55 = vld [vmem:[%s2478_s19] sm:$0xff]  ;;  %v1584_v56 = vld [vmem:[%s2478_s19 + $0x58] sm:$0xff] }
  0x5c   :  { %487 = vmatpush.bf16.msrb.mxu0 %v1556_v1  ;;  %v1583_v57 = vld [vmem:[%s2478_s19 + $0x50] sm:$0xff]  ;;  %v1582_v58 = vld [vmem:[%s2478_s19 + $0x48] sm:$0xff]  ;;  %v1581_v59 = vld [vmem:[%s2478_s19 + $0x40] sm:$0xff] }
  0x5d   :  { %536 = vmatpush.bf16.msrb.mxu1 %v1571_v14  ;;  %v1627_v13 = vld [vmem:[#allocation14] ss:$0 sm:$0xff] }
  0x5e   :  { %420 = vmatpush.bf16.msra.mxu2 %v1565_v9 }
  0x5f   :  { %461 = vmatpush.bf16.msra.mxu3 %v1560_v10  ;;  %v1626_v10 = vld [vmem:[#allocation12] ss:$0 sm:$0xff] }
  0x60   :  { %648 = vmatpush.bf16.msra.mxu0 %v1580_v34 }
  0x61   :  { %537 = vmatpush.bf16.msrb.mxu1 %v1570_v15 }
  0x62   :  { %421 = vmatpush.bf16.msra.mxu2 %v1564_v11 }
  0x63   :  { %462 = vmatpush.bf16.msra.mxu3 %v1559_v12 }
  0x64   :  { %649 = vmatpush.bf16.msra.mxu0 %v1579_v40 }
  0x65   :  { %538 = vmatpush.bf16.msrb.mxu1 %v1569_v16 }
  0x67   :  { %1377 = vmatmul.msk.bf16.vlgmr.msrb.gmra.mxu0 %vm324_vm0, %v1568_v6 }
  0x68   :  { %650 = vmatpush.bf16.msra.mxu0 %v1578_v45 }
  0x69   :  { %688 = vmatpush.bf16.msra.mxu1 %v1576_v35 }
  0x6c   :  { %651 = vmatpush.bf16.msra.mxu0 %v1577_v54 }
  0x6d   :  { %689 = vmatpush.bf16.msra.mxu1 %v1575_v41  ;;  %v1592_v41 = vld [vmem:[#allocation20 + $0x8] sm:$0xff] }
  0x71   :  { %690 = vmatpush.bf16.msra.mxu1 %v1574_v46 }
  0x75   :  { %691 = vmatpush.bf16.msra.mxu1 %v1573_v55 }
  0xd4   :  { %v337_v17 = vpop.f32.mrf.mxu0 }
  0xd5   :  { %v371_v18 = vpop.f32.mrf.mxu1 }
  0xdc   :  { %v339_v19 = vpop.f32.mrf.mxu0 }
  0xdd   :  { %v373_v20 = vpop.f32.mrf.mxu1  ;;  %v342_v21 = vpack.c.bf16 %v339_v19, %v337_v17 }
  0xde   :  { %v376_v22 = vpack.c.bf16 %v373_v20, %v371_v18  ;;  %v778_v20 = vld [vmem:[#allocation15] sm:$0x3] }
  0xdf   :  { %1372 = vmatmul.msk.bf16.vlgmr.msra.gmra.mxu3 %vm410_vm1, %v342_v21  ;;  %v806_v21 = vld [vmem:[#allocation15 + $0x2] sm:$0x3] }
  0xe0   :  { %1355 = vmatmul.msk.bf16.vlgmr.msra.gmra.mxu2 %vm410_vm1, %v376_v22  ;;  %v886_v22 = vld [vmem:[#allocation15 + $0x4] sm:$0x3] }
  0xe4   :  { %v489_v23 = vpop.f32.mrf.mxu0 }
  0xec   :  { %v491_v24 = vpop.f32.mrf.mxu0 }
  0xed   :  { %v494_v25 = vpack.c.bf16 %v491_v24, %v489_v23  ;;  %v1586_v23 = vld [vmem:[%s2439_s11 + $0x8] sm:$0xff]  ;;  %v1588_v24 = vld [vmem:[%s2439_s11 + $0x18] sm:$0xff] }
  0xef   :  { %1402 = vmatmul.msk.bf16.vlgmr.msrb.gmra.mxu1 %vm410_vm1, %v494_v25  ;;  %v1585_v25 = vld [vmem:[%s2439_s11] sm:$0xff] }
 0x162   :  { %v464_v27 = vpop.f32.mrf.mxu3 }
 0x163   :  { %v423_v26 = vpop.f32.mrf.mxu2 }
 0x164   :  { %v465_v29 = vadd.f32 %v464_v27, %v423_v26  ;;  %v1587_v26 = vld [vmem:[%s2439_s11 + $0x10] sm:$0xff]  ;;  %v1590_v27 = vld [vmem:[%s2439_s11 + $0x28] sm:$0xff] }
 0x16a   :  { %v466_v33 = vpop.f32.mrf.mxu3 }
 0x16b   :  { %v425_v32 = vpop.f32.mrf.mxu2 }
 0x16c   :  { %v540_v28 = vpop.f32.mrf.mxu1  ;;  %v467_v36 = vadd.f32 %v466_v33, %v425_v32 }
 0x16d   :  { %v545_v30 = vadd.f32 %v540_v28, %v465_v29  ;;  %v1589_v28 = vld [vmem:[%s2439_s11 + $0x20] sm:$0xff] }
 0x16e   :  { %v951_v29 = vld [vmem:[%s2479_s5] sm:$0xf] }
 0x16f   :  { %v551_v37 = vmul.f32 %v1624_v31, %v545_v30  ;;  %v1593_v30 = vld [vmem:[#allocation21] sm:$0xff] }
 0x171   :  { %v557_v43 = vadd.f32 %v1625_v38, %v551_v37 }
 0x173   :  { %v559_v48 = vmax.f32 %v557_v43, 0.0 }
 0x174   :  { %v542_v39 = vpop.f32.mrf.mxu1 }
 0x175   :  { %v546_v42 = vadd.f32 %v542_v39, %v467_v36 }
 0x177   :  { %v552_v44 = vmul.f32 %v1624_v31, %v546_v42  ;;  %v2071_v31 = vmov 0   ;;  %v1591_v42 = vld [vmem:[#allocation20] sm:$0xff] }
 0x178   :  { %1623 = vset.pattern.permute.xlu0 %v2071_v31 }
 0x179   :  { %v558_v47 = vadd.f32 %v1625_v38, %v552_v44  ;;  %954 = vperm.xlu0 %1623, %v951_v29  }
 0x17b   :  { %v560_v49 = vmax.f32 %v558_v47, 0.0 }
 0x17d   :  { %v561_v50 = vpack.c.bf16 %v560_v49, %v559_v48  ;;  %v1628_v48 = vld [vmem:[#allocation17] ss:$0 sm:$0xff] }
 0x17f   :  { %574 = vmatpush.bf16.msrb.mxu2 %v561_v50  ;;  %601 = vmatpush.bf16.msrb.mxu3 %v561_v50 }
 0x182   :  { %1403 = vmatmul.msk.bf16.vlgmr.msrb.gmra.mxu2 %vm563_vm2, %v562_v51  ;;  %1404 = vmatmul.msk.bf16.vlgmr.msrb.gmra.mxu3 %vm563_vm2, %v590_v52  ;;  %v1629_v51 = vld [vmem:[#allocation18] ss:$0 sm:$0xff] }
 0x183   :  { %709 = vmatpush.bf16.msra.mxu2 %v561_v50  ;;  %756 = vmatpush.bf16.msra.mxu3 %v1584_v56 }
 0x187   :  { %757 = vmatpush.bf16.msra.mxu3 %v1583_v57  ;;  %850 = vmatpush.bf16.msrb.mxu2 %v1588_v24 }
 0x18b   :  { %758 = vmatpush.bf16.msra.mxu3 %v1582_v58  ;;  %851 = vmatpush.bf16.msrb.mxu2 %v1587_v26 }
 0x18f   :  { %759 = vmatpush.bf16.msra.mxu3 %v1581_v59 }
 0x192   :  { %1447 = vmatmul.msk.bf16.vlgmr.msra.gmra.mxu2 %vm563_vm2, %v698_v53  ;;  %v1630_v53 = vld [vmem:[%s2445_s17] ss:$0 sm:$0xff] }
 0x193   :  { %878 = vmatpush.bf16.msrb.mxu3 %v1586_v23  ;;  %988 = vmatpush.bf16.msra.mxu2 %v1592_v41 }
 0x197   :  { %879 = vmatpush.bf16.msrb.mxu3 %v1585_v25  ;;  %989 = vmatpush.bf16.msra.mxu2 %v1591_v42 }
 0x205   :  { %v576_v60 = vpop.f32.mrf.mxu2  ;;  %v603_v61 = vpop.f32.mrf.mxu3 }
 0x206   :  { %v580_v62 = vpack.c.bf16 %v576_v60, %v576_v60  ;;  %v607_v63 = vpack.c.bf16 %v603_v61, %v603_v61  ;;  %v955_v60 = vpop.permute.xlu0 %954 }
 0x208   :  { %1429 = vmatmul.msk.bf16.vlgmr.msra.gmra.mxu0 %vm410_vm1, %v607_v63  ;;  %1446 = vmatmul.msk.bf16.vlgmr.msra.gmra.mxu1 %vm410_vm1, %v580_v62 }
 0x20d   :  { %v578_v0 = vpop.f32.mrf.mxu2  ;;  %v605_v1 = vpop.f32.mrf.mxu3 }
 0x20e   :  { %v1631_v1 = vld [vmem:[%s2444_s16] ss:$0 sm:$0xff]  ;;  %s2073_s16 = smov 112  }
 0x215   :  { %v711_v2 = vpop.f32.mrf.mxu2 }
 0x216   :  { %v715_v3 = vpack.c.bf16 %v711_v2, %v711_v2 }
 0x218   :  { %1472 = vmatmul.msk.bf16.vlgmr.msra.gmra.mxu3 %vm410_vm1, %v715_v3 }
 0x219   :  { %1020 = vmatpush.bf16.msra.mxu3 %v1593_v30 }
 0x21d   :  { %v713_v4 = vpop.f32.mrf.mxu2 }
 0x285   :  { %v653_v5 = vpop.f32.mrf.mxu0  ;;  %v693_v6 = vpop.f32.mrf.mxu1 }
 0x286   :  { %v694_v9 = vadd.f32 %v693_v6, %v653_v5 }
 0x28d   :  { %v695_v7 = vpop.f32.mrf.mxu1  ;;  %v655_v8 = vpop.f32.mrf.mxu0 }
 0x29b   :  { %v761_v11 = vpop.f32.mrf.mxu3 }
 0x29c   :  { %v765_v12 = vadd.f32 %v761_v11, %v694_v9 }
 0x29e   :  { %v770_v14 = vmul.f32 %v1626_v10, %v765_v12 }
 0x2a0   :  { %v775_v15 = vadd.f32 %v1627_v13, %v770_v14 }
 0x2a2   :  { %v776_v16 = vmax.f32 %v775_v15, 0.0 }
 0x2a3   :  { %v763_v17 = vpop.f32.mrf.mxu3 }
 0x2a4   :  { %v777_v18 = vpack.c.bf16 %v776_v16, %v776_v16 }
 0x2a6   :  { %v785_v19 = vsel %vm783_vm3, %v777_v18, 0 }
 0x2a7   :  { %794 = vmatpush.bf16.msrb.mxu0 %v785_v19  ;;  %817 = vmatpush.bf16.msrb.mxu1 %v785_v19 }
 0x2aa   :  { %1473 = vmatmul.msk.bf16.vlgmr.msrb.gmra.mxu0 %vm779_vm4, %v778_v20  ;;  %1474 = vmatmul.msk.bf16.vlgmr.msrb.gmra.mxu1 %vm779_vm4, %v806_v21 }
 0x2ab   :  { %897 = vmatpush.bf16.msra.mxu0 %v785_v19  ;;  %930 = vmatpush.bf16.msra.mxu1 %v1590_v27 }
 0x2af   :  { %931 = vmatpush.bf16.msra.mxu1 %v1589_v28  ;;  %1081 = vmatpush.bf16.msrb.mxu0 %v1593_v30 }
 0x2ba   :  { %1497 = vmatmul.msk.bf16.vlgmr.msra.gmra.mxu0 %vm779_vm4, %v886_v22 }
 0x327   :  { %v796_v32 = vpop.f32.mrf.mxu0  ;;  %v819_v33 = vpop.f32.mrf.mxu1 }
 0x328   :  { %v800_v34 = vpack.c.bf16 %v796_v32, %v796_v32  ;;  %v823_v35 = vpack.c.bf16 %v819_v33, %v819_v33 }
 0x32a   :  { %1496 = vmatmul.msk.bf16.vlgmr.msrb.gmra.mxu3 %vm324_vm0, %v800_v34  ;;  %1487 = vmatmul.msk.bf16.vlgmr.msrb.gmra.mxu2 %vm324_vm0, %v823_v35 }
 0x32f   :  { %v798_v36 = vpop.f32.mrf.mxu0  ;;  %v821_v37 = vpop.f32.mrf.mxu1 }
 0x337   :  { %v899_v38 = vpop.f32.mrf.mxu0 }
 0x338   :  { %v903_v39 = vpack.c.bf16 %v899_v38, %v899_v38 }
 0x33a   :  { %1510 = vmatmul.msk.bf16.vlgmr.msra.gmra.mxu1 %vm324_vm0, %v903_v39  ;;  %1021 = vmatmul.bf16.vlgmr.msra.gmra.mxu3 %v2071_v31 }
 0x33f   :  { %v901_v40 = vpop.f32.mrf.mxu0 }
 0x3ad   :  { %v881_v43 = vpop.f32.mrf.mxu3  ;;  %v853_v44 = vpop.f32.mrf.mxu2 }
 0x3ae   :  { %v882_v47 = vadd.f32 %v881_v43, %v853_v44 }
 0x3b5   :  { %v883_v45 = vpop.f32.mrf.mxu3  ;;  %v855_v46 = vpop.f32.mrf.mxu2 }
 0x3b7   :  { %v933_v49 = vpop.f32.mrf.mxu1 }
 0x3b8   :  { %v937_v50 = vadd.f32 %v933_v49, %v882_v47 }
 0x3ba   :  { %v942_v52 = vmul.f32 %v1628_v48, %v937_v50 }
 0x3bc   :  { %v947_v54 = vadd.f32 %v1629_v51, %v942_v52 }
 0x3bd   :  { %v1022_v55 = vpop.f32.mrf.mxu3 }
 0x3be   :  { %v948_v56 = vmax.f32 %v947_v54, 0.0  ;;  %v1023_v57 = vadd.f32 %v1630_v53, %v1022_v55  ;;  %v1594_v55 = vld [vmem:[#allocation23] sm:$0xff] }
 0x3bf   :  { %v935_v58 = vpop.f32.mrf.mxu1  ;;  %1152 = vmatpush.bf16.msrb.mxu1 %v1594_v55 }
 0x3c0   :  { %v949_v59 = vpack.c.bf16 %v948_v56, %v948_v56  ;;  %1047 = vrot.lane.b32.xlu0 %v1023_v57, %s2072_s14 }
 0x3c2   :  { %v950_v61 = vunpack.c.l.bf16 %v949_v59 }
 0x3c4   :  { %v957_v62 = vmul.f32 %v955_v60, %v950_v61 }
 0x3c5   :  { %v1024_v63 = vpop.f32.mrf.mxu3 }
 0x3c6   :  { %v958_v0 = vpack.c.bf16 %v957_v62, %v957_v62  ;;  %v1595_v63 = vld [vmem:[#allocation26] sm:$0xff] }
 0x3c7   :  { %1177 = vmatpush.bf16.msrb.mxu2 %v1595_v63 }
 0x3c8   :  { %1519 = vmatmul.msk.bf16.vlgmr.msra.gmra.mxu2 %vm324_vm0, %v958_v0  ;;  %v1597_v0 = vld [vmem:[%s2449_s21 + $0x8] sm:$0xff] }
 0x3c9   :  { %1209 = vmatpush.bf16.msrb.mxu3 %v1597_v0 }
 0x432   :  { %v1048_v17 = vpop.permute.xlu0 %1047 }
 0x44b   :  { %v991_v2 = vpop.f32.mrf.mxu2 }
 0x44c   :  { %v992_v3 = vadd.f32 %v1631_v1, %v991_v2  ;;  %v1632_v1 = vld [vmem:[#allocation24] ss:$0 sm:$0xff] }
 0x44e   :  { %996 = vst.msk [vmem:[#allocation2] sm:$0xf] %vm995_vm5, %v992_v3 }
 0x453   :  { %v993_v4 = vpop.f32.mrf.mxu2 }
 0x455   :  { %v997_v5 = vld [vmem:[#allocation2] sm:$0x3]  ;;  %v1066_v35 = vld [vmem:[#allocation2 + $0x2] sm:$0x3] }
 0x456   :  { %v1026_v6 = vadd.f32 %v1023_v57, %v997_v5 }
 0x458   :  { %v1524_v7 = vmul.f32 -1.442695, %v1026_v6  ;;  %v1596_v6 = vld [vmem:[%s2449_s21] sm:$0xff] }
 0x459   :  { %1210 = vmatpush.bf16.msrb.mxu3 %v1596_v6 }
 0x45a   :  { %1634 = vpow2.f32 %v1524_v7 }
 0x460   :  { %v1635_v8 = vpop.eup %1634 }
 0x461   :  { %v1030_v9 = vadd.f32 1.0, %v1635_v8 }
 0x463   :  { %1636 = vrcp.f32 %v1030_v9  ;;  %v1042_v13 = vand.u32 2147483648, %v1030_v9  ;;  %v1040_v15 = vand.u32 2147483647, %v1030_v9  ;;  %vm1036_vm7 = vweird.f32 %v1030_v9 }
 0x465   :  { %v1043_v18 = vor.u32 1.1754944e-38, %v1042_v13  ;;  %vm1041_vm9 = vcmp.eq.f32.partialorder %v1040_v15, 8.507059e+37 }
 0x469   :  { %v1637_v10 = vpop.eup %1636 }
 0x46a   :  { %v1032_v11 = vmul.f32 %v1637_v10, %v1030_v9  ;;  %vm1037_vm6 = vweird.f32 %v1637_v10 }
 0x46b   :  { %vm1038_vm8 = vmor %vm1036_vm7, %vm1037_vm6 }
 0x46c   :  { %v1033_v12 = vsub.f32 1.0, %v1032_v11 }
 0x46e   :  { %v1034_v14 = vmul.f32 %v1637_v10, %v1033_v12 }
 0x470   :  { %v1035_v16 = vadd.f32 %v1637_v10, %v1034_v14 }
 0x472   :  { %v1039_v19 = vsel %vm1038_vm8, %v1637_v10, %v1035_v16 }
 0x473   :  { %v1044_v20 = vsel %vm1041_vm9, %v1043_v18, %v1039_v19  ;;  %v1230_v19 = vld [vmem:[%s2450_s22] sm:$0xf] }
 0x474   :  { %v1050_v21 = vmul.f32 %v1048_v17, %v1044_v20  ;;  %v1057_v25 = vsub.f32 1.0, %v1044_v20  ;;  %v1063_v27 = vmul.f32 0.0, %v1044_v20  ;;  %v1235_v20 = vsel %vm783_vm3, %v1230_v19, 0 }
 0x475   :  { %1244 = vmatpush.bf16.msra.mxu0 %v1235_v20 }
 0x476   :  { %1052 = vrot.lane.b32.xlu1 %v1050_v21, %s2058_s9  ;;  %v1599_v21 = vld [vmem:[%s2451_s23 + $0x8] sm:$0xff] }
 0x477   :  { %1280 = vmatpush.bf16.msra.mxu1 %v1599_v21 }
 0x4e8   :  { %v1053_v22 = vpop.permute.xlu1 %1052 }
 0x4e9   :  { %v1055_v23 = vadd.f32 %v1053_v22, %v997_v5 }
 0x4eb   :  { %1638 = vtanh.f32 %v1055_v23 }
 0x4f1   :  { %v1639_v24 = vpop.eup %1638 }
 0x4f2   :  { %1059 = vrot.lane.b32.xlu1 %v1639_v24, %s2073_s16 }
 0x564   :  { %v1060_v26 = vpop.permute.xlu1 %1059 }
 0x565   :  { %v1062_v28 = vmul.f32 %v1060_v26, %v1057_v25  ;;  %v1598_v26 = vld [vmem:[%s2451_s23] sm:$0xff] }
 0x566   :  { %1281 = vmatpush.bf16.msra.mxu1 %v1598_v26 }
 0x567   :  { %v1064_v29 = vadd.f32 %v1063_v27, %v1062_v28 }
 0x569   :  { %v1067_v30 = vpack.c.bf16 %v1064_v29, %v1064_v29 }
 0x56b   :  { %1069 = vrot.lane.b32.xlu2 %v1067_v30, %s2073_s16  ;;  %v1633_v30 = vld [vmem:[%s2452_s24] ss:$0 sm:$0xff] }
 0x5c5   :  { %v1070_v31 = vpop.permute.xlu2 %1069 }
 0x5c6   :  { %1525 = vmatmul.msk.bf16.vlgmr.msrb.gmra.mxu0 %vm563_vm2, %v1070_v31 }
 0x643   :  { %v1083_v32 = vpop.f32.mrf.mxu0 }
 0x644   :  { %v1084_v33 = vadd.f32 %v1630_v53, %v1083_v32 }
 0x646   :  { %1108 = vrot.lane.b32.xlu2 %v1084_v33, %s2072_s14  ;;  %v1087_v36 = vadd.f32 %v1084_v33, %v1066_v35 }
 0x648   :  { %v1526_v37 = vmul.f32 -1.442695, %v1087_v36 }
 0x64a   :  { %1640 = vpow2.f32 %v1526_v37 }
 0x64b   :  { %v1085_v34 = vpop.f32.mrf.mxu0 }
 0x650   :  { %v1641_v38 = vpop.eup %1640 }
 0x651   :  { %v1091_v39 = vadd.f32 1.0, %v1641_v38 }
 0x653   :  { %1642 = vrcp.f32 %v1091_v39  ;;  %v1103_v45 = vand.u32 2147483648, %v1091_v39  ;;  %vm1097_vm11 = vweird.f32 %v1091_v39  ;;  %v1101_v46 = vand.u32 2147483647, %v1091_v39 }
 0x655   :  { %v1104_v48 = vor.u32 1.1754944e-38, %v1103_v45  ;;  %vm1102_vm13 = vcmp.eq.f32.partialorder %v1101_v46, 8.507059e+37 }
 0x659   :  { %v1643_v40 = vpop.eup %1642 }
 0x65a   :  { %v1093_v41 = vmul.f32 %v1643_v40, %v1091_v39  ;;  %vm1098_vm10 = vweird.f32 %v1643_v40 }
 0x65b   :  { %vm1099_vm12 = vmor %vm1097_vm11, %vm1098_vm10 }
 0x65c   :  { %v1094_v42 = vsub.f32 1.0, %v1093_v41 }
 0x65e   :  { %v1095_v43 = vmul.f32 %v1643_v40, %v1094_v42 }
 0x660   :  { %v1096_v44 = vadd.f32 %v1643_v40, %v1095_v43 }
 0x662   :  { %v1100_v47 = vsel %vm1099_vm12, %v1643_v40, %v1096_v44 }
 0x663   :  { %v1105_v50 = vsel %vm1102_vm13, %v1104_v48, %v1100_v47 }
 0x664   :  { %v1118_v56 = vsub.f32 1.0, %v1105_v50  ;;  %v1124_v58 = vmul.f32 %v1105_v50, %v1064_v29 }
 0x6a0   :  { %v1109_v49 = vpop.permute.xlu2 %1108 }
 0x6a1   :  { %v1111_v51 = vmul.f32 %v1109_v49, %v1105_v50 }
 0x6a3   :  { %1113 = vrot.lane.b32.xlu0 %v1111_v51, %s2058_s9 }
 0x715   :  { %v1114_v52 = vpop.permute.xlu0 %1113 }
 0x716   :  { %v1116_v53 = vadd.f32 %v1114_v52, %v1066_v35 }
 0x718   :  { %1644 = vtanh.f32 %v1116_v53 }
 0x71e   :  { %v1645_v54 = vpop.eup %1644 }
 0x71f   :  { %1120 = vrot.lane.b32.xlu1 %v1645_v54, %s2073_s16 }
 0x791   :  { %v1121_v57 = vpop.permute.xlu1 %1120 }
 0x792   :  { %v1123_v59 = vmul.f32 %v1121_v57, %v1118_v56 }
 0x794   :  { %v1125_v60 = vadd.f32 %v1124_v58, %v1123_v59 }
 0x796   :  { %v1126_v61 = vpack.c.bf16 %v1125_v60, %v1125_v60 }
 0x798   :  { %1134 = vrot.lane.b32.xlu2 %v1126_v61, %s2073_s16 }
 0x7f2   :  { %v1135_v62 = vpop.permute.xlu2 %1134 }
 0x7f3   :  { %1531 = vmatmul.msk.bf16.vlgmr.msrb.gmra.mxu1 %vm563_vm2, %v1135_v62 }
 0x870   :  { %v1154_v2 = vpop.f32.mrf.mxu1 }
 0x871   :  { %v1155_v3 = vadd.f32 %v1632_v1, %v1154_v2 }
 0x873   :  { %v1158_v4 = vpack.c.bf16 %v1155_v3, %v1155_v3 }
 0x875   :  { %1536 = vmatmul.msk.bf16.vlgmr.msrb.gmra.mxu2 %vm563_vm2, %v1158_v4 }
 0x878   :  { %v1156_v5 = vpop.f32.mrf.mxu1 }
 0x8f8   :  { %v1179_v7 = vpop.f32.mrf.mxu2 }
 0x8f9   :  { %v1183_v8 = vpack.c.bf16 %v1179_v7, %v1179_v7 }
 0x8fb   :  { %1545 = vmatmul.msk.bf16.vlgmr.msrb.gmra.mxu3 %vm324_vm0, %v1183_v8 }
 0x900   :  { %v1181_v9 = vpop.f32.mrf.mxu2 }
 0x97e   :  { %v1212_v10 = vpop.f32.mrf.mxu3 }
 0x97f   :  { %v1216_v11 = vmul.f32 0.17677669, %v1212_v10 }
 0x981   :  { %v1218_v12 = vsel %vm1217_vm14, %v1216_v11, -inf }
 0x982   :  { %1219 = vmax.xlane.f32.xlu0 %v1218_v12 }
 0x986   :  { %v1214_v13 = vpop.f32.mrf.mxu3 }
 0x9f5   :  { %v1220_v14 = vpop.xlane.xlu0 %1219 }
 0x9f6   :  { %v1221_v15 = vsub.f32 %v1216_v11, %v1220_v14 }
 0x9f8   :  { %v1222_v16 = vmul.f32 1.442695, %v1221_v15 }
 0x9fa   :  { %1646 = vpow2.f32 %v1222_v16 }
 0xa00   :  { %v1647_v17 = vpop.eup %1646 }
 0xa01   :  { %v1224_v18 = vsel %vm1217_vm14, %v1647_v17, 0.0 }
 0xa02   :  { %1225 = vadd.xlane.f32.xlu1 %v1224_v18 }
 0xa75   :  { %v1226_v22 = vpop.xlane.xlu1 %1225 }
 0xa76   :  { %1648 = vrcp.f32 %v1226_v22 }
 0xa7c   :  { %v1649_v23 = vpop.eup %1648 }
 0xa7d   :  { %v1228_v24 = vmul.f32 %v1649_v23, %v1647_v17 }
 0xa7f   :  { %v1229_v25 = vpack.c.bf16 %v1228_v24, %v1228_v24 }
 0xa81   :  { %1546 = vmatmul.msk.bf16.vlgmr.msra.gmra.mxu0 %vm779_vm4, %v1229_v25 }
 0xafe   :  { %v1246_v27 = vpop.f32.mrf.mxu0 }
 0xaff   :  { %v1250_v28 = vpack.c.bf16 %v1246_v27, %v1246_v27 }
 0xb01   :  { %1555 = vmatmul.msk.bf16.vlgmr.msra.gmra.mxu1 %vm324_vm0, %v1250_v28 }
 0xb06   :  { %v1248_v29 = vpop.f32.mrf.mxu0 }
 0xb7e   :  { %v1283_v31 = vpop.f32.mrf.mxu1 }
 0xb7f   :  { %v1284_v32 = vadd.f32 %v1633_v30, %v1283_v31 }
 0xb81   :  { %1288 = vst.msk [vmem:[#allocation27] sm:$0x3] %vm1287_vm15, %v1284_v32 }
 0xb82   :  { %1299 = dma.vmem_to_hbm [thread:$0]  %s1295_s26, 32, %s1297_s0, [#allocation5]  }
 0xb86   :  { %v1285_v33 = vpop.f32.mrf.mxu1 }
 0xb87   :  { %2050 = dma.done.wait [#allocation5], 32  }
 0xb88   :  { %2051 = vsyncadd [#allocation5], 4294967264 }
 0xb89   :  { %1304 = vsyncpa [#allocation4], 1 }
 0xb8a   :  { %1305 = vsyncpa [#allocation7], 1 }
 0xb8b   :  { %1306 = vsyncpa [#allocation10], 1 }
 0xb8c   :  { %1307 = vsyncpa [#allocation13], 1 }
 0xb8d   :  { %1308 = vsyncpa [#allocation16], 1 }
 0xb8e   :  { %1309 = vsyncpa [#allocation19], 1 }
 0xb8f   :  { %1310 = vsyncpa [#allocation22], 1 }
 0xb90   :  { %1311 = vsyncpa [#allocation25], 1 }
 0xb91   :  { %1312 = vsyncpa [#allocation5], 1 }

</bundles_post_ra>
